<compile_context>
chip_gen: v6e
topology: v6e:2x2x1
jax: 0.10.0
libtpu: 0.0.40
codegen_flags: <defaults>
</compile_context>

<pallas_src>
import functools
import math

import jax
import jax.numpy as jnp
from jax import lax
from jax.experimental import pallas as pl
from jax.experimental.pallas import tpu as pltpu


# ----------------------------- helpers --------------------------------------

def _round_up(x, m):
    return ((x + m - 1) // m) * m


# Chunk-dependent VMEM budget; conservative so it also fits v5e's 16 MiB scoped
# default and leaves room for weights / double-buffering on v7x (64 MiB VMEM).
_VMEM_CHUNK_BUDGET = 12 << 20


def _chunk_cost(t_chunk, b_tile, hidden, in_dim):
    """Estimated chunk-dependent VMEM bytes (gx scratch + pipelined x/out blocks)."""
    return (t_chunk * b_tile * 3 * hidden * 4      # gx scratch (f32)
            + 2 * t_chunk * b_tile * in_dim * 2    # x chunk, double-buffered (bf16)
            + 2 * t_chunk * b_tile * 4)            # out block, double-buffered (f32)


def _choose_chunk(seq_len, b_tile, hidden, in_dim):
    """Sequence-chunk length.

    Whole (8-rounded) sequence when it is small and fits the budget (single
    grid step on the recurrent axis); otherwise a multiple of 128 so that the
    (b_tile, t_chunk) output block is lane-dense and satisfies the (8,128)
    BlockSpec rule for multi-chunk grids."""
    whole = _round_up(seq_len, 8)
    if whole <= 256 and _chunk_cost(whole, b_tile, hidden, in_dim) <= _VMEM_CHUNK_BUDGET:
        return whole
    if _chunk_cost(256, b_tile, hidden, in_dim) <= _VMEM_CHUNK_BUDGET:
        return 256
    return 128


# ----------------------------- kernel ---------------------------------------

def gru_chunk_kernel(x_ref, wih_ref, whh_ref, bgx_ref, bhn_ref, wfc_ref, bfc_ref,
                     out_ref, h_ref, gx_ref, *, mxu_dtype):
    """One grid step == one (batch_tile, seq_chunk) tile of the GRU + head.

    x_ref   : (T, Bt, I)   chunk of inputs (time-major), mxu_dtype
    wih_ref : (I, 3H)      W_ih^T, gate-major columns [r|z|n], mxu_dtype
    whh_ref : (H, 3H)      W_hh^T, mxu_dtype
    bgx_ref : (1, 3H)      b_ih with b_hh's r/z thirds folded in (f32)
    bhn_ref : (1, H)       n-gate hidden bias (stays inside the r* term) (f32)
    wfc_ref : (1, H)       fc weight (f32)
    bfc_ref : (1, 1)       fc bias (f32)
    out_ref : (Bt, T)      sigmoid(fc(h_t)) for the whole chunk (lane dim = time)
    h_ref   : (Bt, H)      VMEM scratch: hidden state carried across chunks (f32)
    gx_ref  : (T, Bt, 3H)  VMEM scratch: hoisted input projection (f32)
    """
    c = pl.program_id(1)  # sequence-chunk axis (innermost, recurrent)

    @pl.when(c == 0)
    def _():
        # fresh hidden state at the start of every batch tile's time sweep
        h_ref[...] = jnp.zeros_like(h_ref)

    T, Bt, I = x_ref.shape
    H = h_ref.shape[-1]

    # ---- hoisted input projection: ONE GEMM per chunk, f32 accumulation -----
    x_all = x_ref[...].reshape(T * Bt, I)
    gx_all = (jnp.dot(x_all, wih_ref[...], preferred_element_type=jnp.float32)
              + bgx_ref[...])
    gx_ref[...] = gx_all.reshape(T, Bt, 3 * H)

    whh = whh_ref[...]          # (H, 3H), mxu_dtype
    bhn = bhn_ref[...]          # (1, H),  f32
    wfc = wfc_ref[...]          # (1, H),  f32

    # ---- sequential recurrence: only h @ W_hh remains per timestep ----------
    # T is small and static -> unrolled at trace time; gx is re-loaded from
    # VMEM scratch each step so the unrolled loop does not hold (T,Bt,3H) live.
    h = h_ref[...]              # (Bt, H), f32
    for t in range(T):
        gx = gx_ref[t]                                           # (Bt, 3H) f32
        gh = jnp.dot(h.astype(mxu_dtype), whh,
                     preferred_element_type=jnp.float32)         # (Bt, 3H) f32
        r = jax.nn.sigmoid(gx[:, 0:H] + gh[:, 0:H])
        z = jax.nn.sigmoid(gx[:, H:2 * H] + gh[:, H:2 * H])
        n = jnp.tanh(gx[:, 2 * H:3 * H] + r * (gh[:, 2 * H:3 * H] + bhn))
        h = (1.0 - z) * n + z * h
        # FC head contribution for this step (off the serial dependence chain);
        # raw logit stored into one time-lane of the output block.
        out_ref[:, t:t + 1] = jnp.sum(h * wfc, axis=-1, keepdims=True)
    h_ref[...] = h

    # ---- bias + sigmoid once per chunk over the whole (Bt, T) slab ----------
    out_ref[...] = jax.nn.sigmoid(out_ref[...] + bfc_ref[...])


# ----------------------------- wrapper --------------------------------------

def rnn_forward_pallas(x, params, *, t_chunk=None, b_tile=None,
                       matmul_dtype=jnp.bfloat16):
    """x: (batch, seq, input_dim).  Returns a stacked (seq, batch) array whose
    row t equals the PyTorch module's outputs[t] (a (batch,) vector).

    matmul_dtype: dtype of the MXU operands (x, h, W_ih^T, W_hh^T).  bf16 is
    the fast default; accumulation and all gate math stay f32 either way."""
    B, S, I = x.shape
    H = params["w_hh"].shape[1]
    G3 = 3 * H

    # ---- tile-size selection (sublane-aligned batch, VMEM-budgeted chunk) ---
    if b_tile is None:
        b_tile = min(_round_up(B, 8), 128)
        while b_tile > 8 and _chunk_cost(128, b_tile, H, I) > _VMEM_CHUNK_BUDGET:
            b_tile //= 2
    b_tile = max(8, _round_up(b_tile, 8))
    Bp = _round_up(B, b_tile)

    if t_chunk is None:
        t_chunk = _choose_chunk(S, b_tile, H, I)
    Sp = _round_up(S, t_chunk)
    nb, nc = Bp // b_tile, Sp // t_chunk

    # ---- input: time-major, zero-padded batch/seq, MXU dtype ----------------
    x_tm = jnp.transpose(x, (1, 0, 2)).astype(jnp.float32)           # (S, B, I)
    x_tm = jnp.pad(x_tm, ((0, Sp - S), (0, Bp - B), (0, 0))).astype(matmul_dtype)

    # ---- weight preprocessing ------------------------------------------------
    wih_t = params["w_ih"].T.astype(matmul_dtype)                    # (I, 3H)
    whh_t = params["w_hh"].T.astype(matmul_dtype)                    # (H, 3H)
    b_ih = params["b_ih"].astype(jnp.float32)
    b_hh = params["b_hh"].astype(jnp.float32)
    # fold b_hh's r/z thirds into the hoisted-GEMM bias; keep the n-gate hidden
    # bias separate (it sits inside the r * (...) term in the GRU equations).
    b_gx = (b_ih + jnp.concatenate(
        [b_hh[:2 * H], jnp.zeros((H,), jnp.float32)])).reshape(1, G3)  # (1, 3H)
    b_hn = b_hh[2 * H:].reshape(1, H)                                  # (1, H)
    w_fc = params["w_fc"].astype(jnp.float32).reshape(1, H)            # (1, H)
    b_fc = params["b_fc"].astype(jnp.float32).reshape(1, 1)            # (1, 1)

    kernel = functools.partial(gru_chunk_kernel, mxu_dtype=matmul_dtype)

    out_bs = pl.pallas_call(
        kernel,
        out_shape=jax.ShapeDtypeStruct((Bp, Sp), jnp.float32),
        grid_spec=pltpu.PrefetchScalarGridSpec(
            num_scalar_prefetch=0,
            grid=(nb, nc),            # batch tiles (parallel) x seq chunks (recurrent)
            in_specs=[
                pl.BlockSpec((t_chunk, b_tile, I), lambda b, c: (c, b, 0)),  # x chunk
                pl.BlockSpec((I, G3), lambda b, c: (0, 0)),                  # W_ih^T
                pl.BlockSpec((H, G3), lambda b, c: (0, 0)),                  # W_hh^T
                pl.BlockSpec((1, G3), lambda b, c: (0, 0)),                  # folded bias
                pl.BlockSpec((1, H), lambda b, c: (0, 0)),                   # b_hn
                pl.BlockSpec((1, H), lambda b, c: (0, 0)),                   # w_fc
                pl.BlockSpec((1, 1), lambda b, c: (0, 0)),                   # b_fc
            ],
            # lane-dense writeback: last dim of the output block is the time chunk
            out_specs=pl.BlockSpec((b_tile, t_chunk), lambda b, c: (b, c)),
            scratch_shapes=[
                pltpu.VMEM((b_tile, H), jnp.float32),           # carried hidden state
                pltpu.VMEM((t_chunk, b_tile, G3), jnp.float32),  # hoisted gx per chunk
            ],
        ),
        compiler_params=pltpu.CompilerParams(
            # batch tiles are independent (megacore-shardable); the seq-chunk
            # axis is a sequential recurrence carried via VMEM scratch.
            dimension_semantics=("parallel", "arbitrary"),
        ),
    )(x_tm, wih_t, whh_t, b_gx, b_hn, w_fc, b_fc)

    # drop batch/seq padding and return (seq, batch): row t == PyTorch outputs[t]
    return out_bs[:B, :S].T


# ----------------------------- reference ------------------------------------

def rnn_forward_ref(x, params):
    """Pure-JAX reference (same math as torch.nn.GRU + fc + sigmoid)."""
    B, S, I = x.shape
    H = params["w_hh"].shape[1]
    w_ih_t, w_hh_t = params["w_ih"].T, params["w_hh"].T
    b_ih, b_hh = params["b_ih"], params["b_hh"]

    def step(h, x_t):
        gx = x_t @ w_ih_t + b_ih
        gh = h @ w_hh_t + b_hh
        r = jax.nn.sigmoid(gx[:, :H] + gh[:, :H])
        z = jax.nn.sigmoid(gx[:, H:2 * H] + gh[:, H:2 * H])
        n = jnp.tanh(gx[:, 2 * H:] + r * gh[:, 2 * H:])
        h_new = (1.0 - z) * n + z * h
        return h_new, h_new

    h0 = jnp.zeros((B, H), jnp.float32)
    _, hs = lax.scan(step, h0, jnp.transpose(x, (1, 0, 2)))   # (S, B, H)
    logits = hs @ params["w_fc"].T + params["b_fc"]           # (S, B, 1)
    return jax.nn.sigmoid(logits)[:, :, 0]                    # (S, B)


def init_params(key, input_dim, hidden_dim):
    """Deterministic init matching PyTorch's uniform(-1/sqrt(H), 1/sqrt(H))."""
    ks = jax.random.split(key, 6)
    bound = 1.0 / math.sqrt(hidden_dim)
    u = lambda k, shape: jax.random.uniform(k, shape, jnp.float32, -bound, bound)
    return {
        "w_ih": u(ks[0], (3 * hidden_dim, input_dim)),
        "w_hh": u(ks[1], (3 * hidden_dim, hidden_dim)),
        "b_ih": u(ks[2], (3 * hidden_dim,)),
        "b_hh": u(ks[3], (3 * hidden_dim,)),
        "w_fc": u(ks[4], (1, hidden_dim)),
        "b_fc": u(ks[5], (1,)),
    }


if __name__ == "__main__":
    B, S, I, H = 2, 8, 4, 32

    key = jax.random.PRNGKey(0)
    k_x, k_p = jax.random.split(key)
    x = jax.random.normal(k_x, (B, S, I), jnp.float32)
    params = init_params(k_p, I, H)

    ref = rnn_forward_ref(x, params)                                   # (S, B)

    # exact-math path (f32 MXU operands): must match the reference tightly
    out_f32 = rnn_forward_pallas(x, params, matmul_dtype=jnp.float32)
    out_f32 = jax.block_until_ready(out_f32)
    assert out_f32.shape == (S, B)
    assert jnp.allclose(out_f32, ref, atol=1e-5, rtol=1e-5), "f32 path mismatch"

    # fast default path (bf16 MXU operands, f32 accumulation + f32 gate math)
    out = rnn_forward_pallas(x, params)
    out = jax.block_until_ready(out)
    assert out.shape == (S, B)
    assert jnp.allclose(out, ref, atol=5e-2, rtol=5e-2), "bf16 path mismatch"

    # mirror the PyTorch module's list-of-(batch,) return with one host-side split
    outputs = list(out)
    assert len(outputs) == S and outputs[0].shape == (B,)

    print("KERNEL_OK")
</pallas_src>

<mosaic_0001>
module attributes {stable_mosaic.version = 11 : i64} {
  func.func @gru_chunk_kernel(%arg0: i32, %arg1: i32, %arg2: memref<8x8x4xf32, #tpu.memory_space<vmem>>, %arg3: memref<4x96xf32, #tpu.memory_space<vmem>>, %arg4: memref<32x96xf32, #tpu.memory_space<vmem>>, %arg5: memref<1x96xf32, #tpu.memory_space<vmem>>, %arg6: memref<1x32xf32, #tpu.memory_space<vmem>>, %arg7: memref<1x32xf32, #tpu.memory_space<vmem>>, %arg8: memref<1x1xf32, #tpu.memory_space<vmem>>, %arg9: memref<8x8xf32, #tpu.memory_space<vmem>>, %arg10: memref<8x32xf32, #tpu.memory_space<vmem>>, %arg11: memref<8x8x96xf32, #tpu.memory_space<vmem>>) attributes {dimension_semantics = [#tpu.dimension_semantics<parallel>, #tpu.dimension_semantics<arbitrary>], iteration_bounds = array<i64: 1, 1>, scalar_prefetch = 0 : i64, scratch_operands = 2 : i64, tpu.core_type = #tpu.core_type<tc>, window_params = [{transform_indices = @transform_0, window_bounds = array<i64: 8, 8, 4>}, {pipeline_mode = #tpu.pipeline_mode<synchronous>, transform_indices = @transform_1, window_bounds = array<i64: 4, 96>}, {pipeline_mode = #tpu.pipeline_mode<synchronous>, transform_indices = @transform_2, window_bounds = array<i64: 32, 96>}, {pipeline_mode = #tpu.pipeline_mode<synchronous>, transform_indices = @transform_3, window_bounds = array<i64: 1, 96>}, {pipeline_mode = #tpu.pipeline_mode<synchronous>, transform_indices = @transform_4, window_bounds = array<i64: 1, 32>}, {pipeline_mode = #tpu.pipeline_mode<synchronous>, transform_indices = @transform_5, window_bounds = array<i64: 1, 32>}, {pipeline_mode = #tpu.pipeline_mode<synchronous>, transform_indices = @transform_6, window_bounds = array<i64: 1, 1>}, {transform_indices = @transform_7, window_bounds = array<i64: 8, 8>}]} {
    %c0_i32 = arith.constant 0 : i32
    %0 = arith.cmpi eq, %arg1, %c0_i32 : i32
    %1 = arith.extui %0 : i1 to i32
    %c0_i32_0 = arith.constant 0 : i32
    %2 = arith.cmpi ne, %1, %c0_i32_0 : i32
    scf.if %2 {
      %cst_100 = arith.constant 0.000000e+00 : f32
      %315 = vector.broadcast %cst_100 : f32 to vector<8x32xf32>
      %c0_101 = arith.constant 0 : index
      %c0_102 = arith.constant 0 : index
      %316 = vector.load %arg10[%c0_101, %c0_102] : memref<8x32xf32, #tpu.memory_space<vmem>>, vector<8x32xf32>
      tpu.vector_store %arg10[%c0_101, %c0_102], %315 {strides = array<i32>} : memref<8x32xf32, #tpu.memory_space<vmem>>, vector<8x32xf32>,
    } else {
    }
    %c0 = arith.constant 0 : index
    %c0_1 = arith.constant 0 : index
    %c0_2 = arith.constant 0 : index
    %3 = vector.load %arg2[%c0, %c0_1, %c0_2] : memref<8x8x4xf32, #tpu.memory_space<vmem>>, vector<8x8x4xf32>
    %4 = vector.shape_cast %3 : vector<8x8x4xf32> to vector<64x4xf32>
    %c0_3 = arith.constant 0 : index
    %c0_4 = arith.constant 0 : index
    %5 = vector.load %arg3[%c0_3, %c0_4] : memref<4x96xf32, #tpu.memory_space<vmem>>, vector<4x96xf32>
    %cst = arith.constant dense<0.000000e+00> : vector<64x96xf32>
    %6 = tpu.matmul %4, %5, %cst {dimension_numbers = #tpu.dot_dimension_numbers<[1], [0], [0], [1], [0, 0, 1, 1], [], []>} : vector<64x4xf32>, vector<4x96xf32>, vector<64x96xf32> -> vector<64x96xf32>
    %c0_5 = arith.constant 0 : index
    %c0_6 = arith.constant 0 : index
    %7 = vector.load %arg5[%c0_5, %c0_6] : memref<1x96xf32, #tpu.memory_space<vmem>>, vector<1x96xf32>
    %8 = vector.broadcast %7 : vector<1x96xf32> to vector<64x96xf32>
    %9 = arith.addf %6, %8 : vector<64x96xf32>
    %10 = vector.shape_cast %9 : vector<64x96xf32> to vector<8x8x96xf32>
    %c0_7 = arith.constant 0 : index
    %c0_8 = arith.constant 0 : index
    %c0_9 = arith.constant 0 : index
    %11 = vector.load %arg11[%c0_7, %c0_8, %c0_9] : memref<8x8x96xf32, #tpu.memory_space<vmem>>, vector<8x8x96xf32>
    tpu.vector_store %arg11[%c0_7, %c0_8, %c0_9], %10 {strides = array<i32>} : memref<8x8x96xf32, #tpu.memory_space<vmem>>, vector<8x8x96xf32>,
    %c0_10 = arith.constant 0 : index
    %c0_11 = arith.constant 0 : index
    %12 = vector.load %arg4[%c0_10, %c0_11] : memref<32x96xf32, #tpu.memory_space<vmem>>, vector<32x96xf32>
    %c0_12 = arith.constant 0 : index
    %c0_13 = arith.constant 0 : index
    %13 = vector.load %arg6[%c0_12, %c0_13] : memref<1x32xf32, #tpu.memory_space<vmem>>, vector<1x32xf32>
    %c0_14 = arith.constant 0 : index
    %c0_15 = arith.constant 0 : index
    %14 = vector.load %arg7[%c0_14, %c0_15] : memref<1x32xf32, #tpu.memory_space<vmem>>, vector<1x32xf32>
    %c0_16 = arith.constant 0 : index
    %c0_17 = arith.constant 0 : index
    %15 = vector.load %arg10[%c0_16, %c0_17] : memref<8x32xf32, #tpu.memory_space<vmem>>, vector<8x32xf32>
    %c0_18 = arith.constant 0 : index
    %c0_19 = arith.constant 0 : index
    %c0_20 = arith.constant 0 : index
    %16 = vector.load %arg11[%c0_18, %c0_19, %c0_20] : memref<8x8x96xf32, #tpu.memory_space<vmem>>, vector<1x8x96xf32>
    %17 = vector.shape_cast %16 : vector<1x8x96xf32> to vector<8x96xf32>
    %cst_21 = arith.constant dense<0.000000e+00> : vector<8x96xf32>
    %18 = tpu.matmul %15, %12, %cst_21 {dimension_numbers = #tpu.dot_dimension_numbers<[1], [0], [0], [1], [0, 0, 1, 1], [], []>} : vector<8x32xf32>, vector<32x96xf32>, vector<8x96xf32> -> vector<8x96xf32>
    %19 = vector.extract_strided_slice %17 {offsets = [0, 0], sizes = [8, 32], strides = [1, 1]} : vector<8x96xf32> to vector<8x32xf32>
    %20 = vector.extract_strided_slice %18 {offsets = [0, 0], sizes = [8, 32], strides = [1, 1]} : vector<8x96xf32> to vector<8x32xf32>
    %21 = arith.addf %19, %20 : vector<8x32xf32>
    %22 = arith.negf %21 : vector<8x32xf32>
    %23 = math.exp %22 : vector<8x32xf32>
    %cst_22 = arith.constant 1.000000e+00 : f32
    %24 = vector.broadcast %cst_22 : f32 to vector<8x32xf32>
    %25 = arith.addf %24, %23 : vector<8x32xf32>
    %26 = arith.divf %24, %25 : vector<8x32xf32>
    %27 = vector.extract_strided_slice %17 {offsets = [0, 32], sizes = [8, 32], strides = [1, 1]} : vector<8x96xf32> to vector<8x32xf32>
    %28 = vector.extract_strided_slice %18 {offsets = [0, 32], sizes = [8, 32], strides = [1, 1]} : vector<8x96xf32> to vector<8x32xf32>
    %29 = arith.addf %27, %28 : vector<8x32xf32>
    %30 = arith.negf %29 : vector<8x32xf32>
    %31 = math.exp %30 : vector<8x32xf32>
    %cst_23 = arith.constant 1.000000e+00 : f32
    %32 = vector.broadcast %cst_23 : f32 to vector<8x32xf32>
    %33 = arith.addf %32, %31 : vector<8x32xf32>
    %34 = arith.divf %32, %33 : vector<8x32xf32>
    %35 = vector.extract_strided_slice %17 {offsets = [0, 64], sizes = [8, 32], strides = [1, 1]} : vector<8x96xf32> to vector<8x32xf32>
    %36 = vector.extract_strided_slice %18 {offsets = [0, 64], sizes = [8, 32], strides = [1, 1]} : vector<8x96xf32> to vector<8x32xf32>
    %37 = vector.broadcast %13 : vector<1x32xf32> to vector<8x32xf32>
    %38 = arith.addf %36, %37 : vector<8x32xf32>
    %39 = arith.mulf %26, %38 : vector<8x32xf32>
    %40 = arith.addf %35, %39 : vector<8x32xf32>
    %41 = math.tanh %40 : vector<8x32xf32>
    %cst_24 = arith.constant 1.000000e+00 : f32
    %42 = vector.broadcast %cst_24 : f32 to vector<8x32xf32>
    %43 = arith.subf %42, %34 : vector<8x32xf32>
    %44 = arith.mulf %43, %41 : vector<8x32xf32>
    %45 = arith.mulf %34, %15 : vector<8x32xf32>
    %46 = arith.addf %44, %45 : vector<8x32xf32>
    %47 = vector.broadcast %14 : vector<1x32xf32> to vector<8x32xf32>
    %48 = arith.mulf %46, %47 : vector<8x32xf32>
    %cst_25 = arith.constant dense<0.000000e+00> : vector<8xf32>
    %49 = vector.multi_reduction <add>, %48, %cst_25 [1] : vector<8x32xf32> to vector<8xf32>
    %50 = vector.shape_cast %49 : vector<8xf32> to vector<8x1xf32>
    %c0_26 = arith.constant 0 : index
    %c0_27 = arith.constant 0 : index
    %51 = vector.load %arg9[%c0_26, %c0_27] : memref<8x8xf32, #tpu.memory_space<vmem>>, vector<8x1xf32>
    tpu.vector_store %arg9[%c0_26, %c0_27], %50 {strides = array<i32>} : memref<8x8xf32, #tpu.memory_space<vmem>>, vector<8x1xf32>,
    %c1 = arith.constant 1 : index
    %c0_28 = arith.constant 0 : index
    %c0_29 = arith.constant 0 : index
    %52 = vector.load %arg11[%c1, %c0_28, %c0_29] : memref<8x8x96xf32, #tpu.memory_space<vmem>>, vector<1x8x96xf32>
    %53 = vector.shape_cast %52 : vector<1x8x96xf32> to vector<8x96xf32>
    %cst_30 = arith.constant dense<0.000000e+00> : vector<8x96xf32>
    %54 = tpu.matmul %46, %12, %cst_30 {dimension_numbers = #tpu.dot_dimension_numbers<[1], [0], [0], [1], [0, 0, 1, 1], [], []>} : vector<8x32xf32>, vector<32x96xf32>, vector<8x96xf32> -> vector<8x96xf32>
    %55 = vector.extract_strided_slice %53 {offsets = [0, 0], sizes = [8, 32], strides = [1, 1]} : vector<8x96xf32> to vector<8x32xf32>
    %56 = vector.extract_strided_slice %54 {offsets = [0, 0], sizes = [8, 32], strides = [1, 1]} : vector<8x96xf32> to vector<8x32xf32>
    %57 = arith.addf %55, %56 : vector<8x32xf32>
    %58 = arith.negf %57 : vector<8x32xf32>
    %59 = math.exp %58 : vector<8x32xf32>
    %cst_31 = arith.constant 1.000000e+00 : f32
    %60 = vector.broadcast %cst_31 : f32 to vector<8x32xf32>
    %61 = arith.addf %60, %59 : vector<8x32xf32>
    %62 = arith.divf %60, %61 : vector<8x32xf32>
    %63 = vector.extract_strided_slice %53 {offsets = [0, 32], sizes = [8, 32], strides = [1, 1]} : vector<8x96xf32> to vector<8x32xf32>
    %64 = vector.extract_strided_slice %54 {offsets = [0, 32], sizes = [8, 32], strides = [1, 1]} : vector<8x96xf32> to vector<8x32xf32>
    %65 = arith.addf %63, %64 : vector<8x32xf32>
    %66 = arith.negf %65 : vector<8x32xf32>
    %67 = math.exp %66 : vector<8x32xf32>
    %cst_32 = arith.constant 1.000000e+00 : f32
    %68 = vector.broadcast %cst_32 : f32 to vector<8x32xf32>
    %69 = arith.addf %68, %67 : vector<8x32xf32>
    %70 = arith.divf %68, %69 : vector<8x32xf32>
    %71 = vector.extract_strided_slice %53 {offsets = [0, 64], sizes = [8, 32], strides = [1, 1]} : vector<8x96xf32> to vector<8x32xf32>
    %72 = vector.extract_strided_slice %54 {offsets = [0, 64], sizes = [8, 32], strides = [1, 1]} : vector<8x96xf32> to vector<8x32xf32>
    %73 = vector.broadcast %13 : vector<1x32xf32> to vector<8x32xf32>
    %74 = arith.addf %72, %73 : vector<8x32xf32>
    %75 = arith.mulf %62, %74 : vector<8x32xf32>
    %76 = arith.addf %71, %75 : vector<8x32xf32>
    %77 = math.tanh %76 : vector<8x32xf32>
    %cst_33 = arith.constant 1.000000e+00 : f32
    %78 = vector.broadcast %cst_33 : f32 to vector<8x32xf32>
    %79 = arith.subf %78, %70 : vector<8x32xf32>
    %80 = arith.mulf %79, %77 : vector<8x32xf32>
    %81 = arith.mulf %70, %46 : vector<8x32xf32>
    %82 = arith.addf %80, %81 : vector<8x32xf32>
    %83 = vector.broadcast %14 : vector<1x32xf32> to vector<8x32xf32>
    %84 = arith.mulf %82, %83 : vector<8x32xf32>
    %cst_34 = arith.constant dense<0.000000e+00> : vector<8xf32>
    %85 = vector.multi_reduction <add>, %84, %cst_34 [1] : vector<8x32xf32> to vector<8xf32>
    %86 = vector.shape_cast %85 : vector<8xf32> to vector<8x1xf32>
    %c0_35 = arith.constant 0 : index
    %c1_36 = arith.constant 1 : index
    %87 = vector.load %arg9[%c0_35, %c1_36] : memref<8x8xf32, #tpu.memory_space<vmem>>, vector<8x1xf32>
    tpu.vector_store %arg9[%c0_35, %c1_36], %86 {strides = array<i32>} : memref<8x8xf32, #tpu.memory_space<vmem>>, vector<8x1xf32>,
    %c2 = arith.constant 2 : index
    %c0_37 = arith.constant 0 : index
    %c0_38 = arith.constant 0 : index
    %88 = vector.load %arg11[%c2, %c0_37, %c0_38] : memref<8x8x96xf32, #tpu.memory_space<vmem>>, vector<1x8x96xf32>
    %89 = vector.shape_cast %88 : vector<1x8x96xf32> to vector<8x96xf32>
    %cst_39 = arith.constant dense<0.000000e+00> : vector<8x96xf32>
    %90 = tpu.matmul %82, %12, %cst_39 {dimension_numbers = #tpu.dot_dimension_numbers<[1], [0], [0], [1], [0, 0, 1, 1], [], []>} : vector<8x32xf32>, vector<32x96xf32>, vector<8x96xf32> -> vector<8x96xf32>
    %91 = vector.extract_strided_slice %89 {offsets = [0, 0], sizes = [8, 32], strides = [1, 1]} : vector<8x96xf32> to vector<8x32xf32>
    %92 = vector.extract_strided_slice %90 {offsets = [0, 0], sizes = [8, 32], strides = [1, 1]} : vector<8x96xf32> to vector<8x32xf32>
    %93 = arith.addf %91, %92 : vector<8x32xf32>
    %94 = arith.negf %93 : vector<8x32xf32>
    %95 = math.exp %94 : vector<8x32xf32>
    %cst_40 = arith.constant 1.000000e+00 : f32
    %96 = vector.broadcast %cst_40 : f32 to vector<8x32xf32>
    %97 = arith.addf %96, %95 : vector<8x32xf32>
    %98 = arith.divf %96, %97 : vector<8x32xf32>
    %99 = vector.extract_strided_slice %89 {offsets = [0, 32], sizes = [8, 32], strides = [1, 1]} : vector<8x96xf32> to vector<8x32xf32>
    %100 = vector.extract_strided_slice %90 {offsets = [0, 32], sizes = [8, 32], strides = [1, 1]} : vector<8x96xf32> to vector<8x32xf32>
    %101 = arith.addf %99, %100 : vector<8x32xf32>
    %102 = arith.negf %101 : vector<8x32xf32>
    %103 = math.exp %102 : vector<8x32xf32>
    %cst_41 = arith.constant 1.000000e+00 : f32
    %104 = vector.broadcast %cst_41 : f32 to vector<8x32xf32>
    %105 = arith.addf %104, %103 : vector<8x32xf32>
    %106 = arith.divf %104, %105 : vector<8x32xf32>
    %107 = vector.extract_strided_slice %89 {offsets = [0, 64], sizes = [8, 32], strides = [1, 1]} : vector<8x96xf32> to vector<8x32xf32>
    %108 = vector.extract_strided_slice %90 {offsets = [0, 64], sizes = [8, 32], strides = [1, 1]} : vector<8x96xf32> to vector<8x32xf32>
    %109 = vector.broadcast %13 : vector<1x32xf32> to vector<8x32xf32>
    %110 = arith.addf %108, %109 : vector<8x32xf32>
    %111 = arith.mulf %98, %110 : vector<8x32xf32>
    %112 = arith.addf %107, %111 : vector<8x32xf32>
    %113 = math.tanh %112 : vector<8x32xf32>
    %cst_42 = arith.constant 1.000000e+00 : f32
    %114 = vector.broadcast %cst_42 : f32 to vector<8x32xf32>
    %115 = arith.subf %114, %106 : vector<8x32xf32>
    %116 = arith.mulf %115, %113 : vector<8x32xf32>
    %117 = arith.mulf %106, %82 : vector<8x32xf32>
    %118 = arith.addf %116, %117 : vector<8x32xf32>
    %119 = vector.broadcast %14 : vector<1x32xf32> to vector<8x32xf32>
    %120 = arith.mulf %118, %119 : vector<8x32xf32>
    %cst_43 = arith.constant dense<0.000000e+00> : vector<8xf32>
    %121 = vector.multi_reduction <add>, %120, %cst_43 [1] : vector<8x32xf32> to vector<8xf32>
    %122 = vector.shape_cast %121 : vector<8xf32> to vector<8x1xf32>
    %c0_44 = arith.constant 0 : index
    %c2_45 = arith.constant 2 : index
    %123 = vector.load %arg9[%c0_44, %c2_45] : memref<8x8xf32, #tpu.memory_space<vmem>>, vector<8x1xf32>
    tpu.vector_store %arg9[%c0_44, %c2_45], %122 {strides = array<i32>} : memref<8x8xf32, #tpu.memory_space<vmem>>, vector<8x1xf32>,
    %c3 = arith.constant 3 : index
    %c0_46 = arith.constant 0 : index
    %c0_47 = arith.constant 0 : index
    %124 = vector.load %arg11[%c3, %c0_46, %c0_47] : memref<8x8x96xf32, #tpu.memory_space<vmem>>, vector<1x8x96xf32>
    %125 = vector.shape_cast %124 : vector<1x8x96xf32> to vector<8x96xf32>
    %cst_48 = arith.constant dense<0.000000e+00> : vector<8x96xf32>
    %126 = tpu.matmul %118, %12, %cst_48 {dimension_numbers = #tpu.dot_dimension_numbers<[1], [0], [0], [1], [0, 0, 1, 1], [], []>} : vector<8x32xf32>, vector<32x96xf32>, vector<8x96xf32> -> vector<8x96xf32>
    %127 = vector.extract_strided_slice %125 {offsets = [0, 0], sizes = [8, 32], strides = [1, 1]} : vector<8x96xf32> to vector<8x32xf32>
    %128 = vector.extract_strided_slice %126 {offsets = [0, 0], sizes = [8, 32], strides = [1, 1]} : vector<8x96xf32> to vector<8x32xf32>
    %129 = arith.addf %127, %128 : vector<8x32xf32>
    %130 = arith.negf %129 : vector<8x32xf32>
    %131 = math.exp %130 : vector<8x32xf32>
    %cst_49 = arith.constant 1.000000e+00 : f32
    %132 = vector.broadcast %cst_49 : f32 to vector<8x32xf32>
    %133 = arith.addf %132, %131 : vector<8x32xf32>
    %134 = arith.divf %132, %133 : vector<8x32xf32>
    %135 = vector.extract_strided_slice %125 {offsets = [0, 32], sizes = [8, 32], strides = [1, 1]} : vector<8x96xf32> to vector<8x32xf32>
    %136 = vector.extract_strided_slice %126 {offsets = [0, 32], sizes = [8, 32], strides = [1, 1]} : vector<8x96xf32> to vector<8x32xf32>
    %137 = arith.addf %135, %136 : vector<8x32xf32>
    %138 = arith.negf %137 : vector<8x32xf32>
    %139 = math.exp %138 : vector<8x32xf32>
    %cst_50 = arith.constant 1.000000e+00 : f32
    %140 = vector.broadcast %cst_50 : f32 to vector<8x32xf32>
    %141 = arith.addf %140, %139 : vector<8x32xf32>
    %142 = arith.divf %140, %141 : vector<8x32xf32>
    %143 = vector.extract_strided_slice %125 {offsets = [0, 64], sizes = [8, 32], strides = [1, 1]} : vector<8x96xf32> to vector<8x32xf32>
    %144 = vector.extract_strided_slice %126 {offsets = [0, 64], sizes = [8, 32], strides = [1, 1]} : vector<8x96xf32> to vector<8x32xf32>
    %145 = vector.broadcast %13 : vector<1x32xf32> to vector<8x32xf32>
    %146 = arith.addf %144, %145 : vector<8x32xf32>
    %147 = arith.mulf %134, %146 : vector<8x32xf32>
    %148 = arith.addf %143, %147 : vector<8x32xf32>
    %149 = math.tanh %148 : vector<8x32xf32>
    %cst_51 = arith.constant 1.000000e+00 : f32
    %150 = vector.broadcast %cst_51 : f32 to vector<8x32xf32>
    %151 = arith.subf %150, %142 : vector<8x32xf32>
    %152 = arith.mulf %151, %149 : vector<8x32xf32>
    %153 = arith.mulf %142, %118 : vector<8x32xf32>
    %154 = arith.addf %152, %153 : vector<8x32xf32>
    %155 = vector.broadcast %14 : vector<1x32xf32> to vector<8x32xf32>
    %156 = arith.mulf %154, %155 : vector<8x32xf32>
    %cst_52 = arith.constant dense<0.000000e+00> : vector<8xf32>
    %157 = vector.multi_reduction <add>, %156, %cst_52 [1] : vector<8x32xf32> to vector<8xf32>
    %158 = vector.shape_cast %157 : vector<8xf32> to vector<8x1xf32>
    %c0_53 = arith.constant 0 : index
    %c3_54 = arith.constant 3 : index
    %159 = vector.load %arg9[%c0_53, %c3_54] : memref<8x8xf32, #tpu.memory_space<vmem>>, vector<8x1xf32>
    tpu.vector_store %arg9[%c0_53, %c3_54], %158 {strides = array<i32>} : memref<8x8xf32, #tpu.memory_space<vmem>>, vector<8x1xf32>,
    %c4 = arith.constant 4 : index
    %c0_55 = arith.constant 0 : index
    %c0_56 = arith.constant 0 : index
    %160 = vector.load %arg11[%c4, %c0_55, %c0_56] : memref<8x8x96xf32, #tpu.memory_space<vmem>>, vector<1x8x96xf32>
    %161 = vector.shape_cast %160 : vector<1x8x96xf32> to vector<8x96xf32>
    %cst_57 = arith.constant dense<0.000000e+00> : vector<8x96xf32>
    %162 = tpu.matmul %154, %12, %cst_57 {dimension_numbers = #tpu.dot_dimension_numbers<[1], [0], [0], [1], [0, 0, 1, 1], [], []>} : vector<8x32xf32>, vector<32x96xf32>, vector<8x96xf32> -> vector<8x96xf32>
    %163 = vector.extract_strided_slice %161 {offsets = [0, 0], sizes = [8, 32], strides = [1, 1]} : vector<8x96xf32> to vector<8x32xf32>
    %164 = vector.extract_strided_slice %162 {offsets = [0, 0], sizes = [8, 32], strides = [1, 1]} : vector<8x96xf32> to vector<8x32xf32>
    %165 = arith.addf %163, %164 : vector<8x32xf32>
    %166 = arith.negf %165 : vector<8x32xf32>
    %167 = math.exp %166 : vector<8x32xf32>
    %cst_58 = arith.constant 1.000000e+00 : f32
    %168 = vector.broadcast %cst_58 : f32 to vector<8x32xf32>
    %169 = arith.addf %168, %167 : vector<8x32xf32>
    %170 = arith.divf %168, %169 : vector<8x32xf32>
    %171 = vector.extract_strided_slice %161 {offsets = [0, 32], sizes = [8, 32], strides = [1, 1]} : vector<8x96xf32> to vector<8x32xf32>
    %172 = vector.extract_strided_slice %162 {offsets = [0, 32], sizes = [8, 32], strides = [1, 1]} : vector<8x96xf32> to vector<8x32xf32>
    %173 = arith.addf %171, %172 : vector<8x32xf32>
    %174 = arith.negf %173 : vector<8x32xf32>
    %175 = math.exp %174 : vector<8x32xf32>
    %cst_59 = arith.constant 1.000000e+00 : f32
    %176 = vector.broadcast %cst_59 : f32 to vector<8x32xf32>
    %177 = arith.addf %176, %175 : vector<8x32xf32>
    %178 = arith.divf %176, %177 : vector<8x32xf32>
    %179 = vector.extract_strided_slice %161 {offsets = [0, 64], sizes = [8, 32], strides = [1, 1]} : vector<8x96xf32> to vector<8x32xf32>
    %180 = vector.extract_strided_slice %162 {offsets = [0, 64], sizes = [8, 32], strides = [1, 1]} : vector<8x96xf32> to vector<8x32xf32>
    %181 = vector.broadcast %13 : vector<1x32xf32> to vector<8x32xf32>
    %182 = arith.addf %180, %181 : vector<8x32xf32>
    %183 = arith.mulf %170, %182 : vector<8x32xf32>
    %184 = arith.addf %179, %183 : vector<8x32xf32>
    %185 = math.tanh %184 : vector<8x32xf32>
    %cst_60 = arith.constant 1.000000e+00 : f32
    %186 = vector.broadcast %cst_60 : f32 to vector<8x32xf32>
    %187 = arith.subf %186, %178 : vector<8x32xf32>
    %188 = arith.mulf %187, %185 : vector<8x32xf32>
    %189 = arith.mulf %178, %154 : vector<8x32xf32>
    %190 = arith.addf %188, %189 : vector<8x32xf32>
    %191 = vector.broadcast %14 : vector<1x32xf32> to vector<8x32xf32>
    %192 = arith.mulf %190, %191 : vector<8x32xf32>
    %cst_61 = arith.constant dense<0.000000e+00> : vector<8xf32>
    %193 = vector.multi_reduction <add>, %192, %cst_61 [1] : vector<8x32xf32> to vector<8xf32>
    %194 = vector.shape_cast %193 : vector<8xf32> to vector<8x1xf32>
    %c0_62 = arith.constant 0 : index
    %c4_63 = arith.constant 4 : index
    %195 = vector.load %arg9[%c0_62, %c4_63] : memref<8x8xf32, #tpu.memory_space<vmem>>, vector<8x1xf32>
    tpu.vector_store %arg9[%c0_62, %c4_63], %194 {strides = array<i32>} : memref<8x8xf32, #tpu.memory_space<vmem>>, vector<8x1xf32>,
    %c5 = arith.constant 5 : index
    %c0_64 = arith.constant 0 : index
    %c0_65 = arith.constant 0 : index
    %196 = vector.load %arg11[%c5, %c0_64, %c0_65] : memref<8x8x96xf32, #tpu.memory_space<vmem>>, vector<1x8x96xf32>
    %197 = vector.shape_cast %196 : vector<1x8x96xf32> to vector<8x96xf32>
    %cst_66 = arith.constant dense<0.000000e+00> : vector<8x96xf32>
    %198 = tpu.matmul %190, %12, %cst_66 {dimension_numbers = #tpu.dot_dimension_numbers<[1], [0], [0], [1], [0, 0, 1, 1], [], []>} : vector<8x32xf32>, vector<32x96xf32>, vector<8x96xf32> -> vector<8x96xf32>
    %199 = vector.extract_strided_slice %197 {offsets = [0, 0], sizes = [8, 32], strides = [1, 1]} : vector<8x96xf32> to vector<8x32xf32>
    %200 = vector.extract_strided_slice %198 {offsets = [0, 0], sizes = [8, 32], strides = [1, 1]} : vector<8x96xf32> to vector<8x32xf32>
    %201 = arith.addf %199, %200 : vector<8x32xf32>
    %202 = arith.negf %201 : vector<8x32xf32>
    %203 = math.exp %202 : vector<8x32xf32>
    %cst_67 = arith.constant 1.000000e+00 : f32
    %204 = vector.broadcast %cst_67 : f32 to vector<8x32xf32>
    %205 = arith.addf %204, %203 : vector<8x32xf32>
    %206 = arith.divf %204, %205 : vector<8x32xf32>
    %207 = vector.extract_strided_slice %197 {offsets = [0, 32], sizes = [8, 32], strides = [1, 1]} : vector<8x96xf32> to vector<8x32xf32>
    %208 = vector.extract_strided_slice %198 {offsets = [0, 32], sizes = [8, 32], strides = [1, 1]} : vector<8x96xf32> to vector<8x32xf32>
    %209 = arith.addf %207, %208 : vector<8x32xf32>
    %210 = arith.negf %209 : vector<8x32xf32>
    %211 = math.exp %210 : vector<8x32xf32>
    %cst_68 = arith.constant 1.000000e+00 : f32
    %212 = vector.broadcast %cst_68 : f32 to vector<8x32xf32>
    %213 = arith.addf %212, %211 : vector<8x32xf32>
    %214 = arith.divf %212, %213 : vector<8x32xf32>
    %215 = vector.extract_strided_slice %197 {offsets = [0, 64], sizes = [8, 32], strides = [1, 1]} : vector<8x96xf32> to vector<8x32xf32>
    %216 = vector.extract_strided_slice %198 {offsets = [0, 64], sizes = [8, 32], strides = [1, 1]} : vector<8x96xf32> to vector<8x32xf32>
    %217 = vector.broadcast %13 : vector<1x32xf32> to vector<8x32xf32>
    %218 = arith.addf %216, %217 : vector<8x32xf32>
    %219 = arith.mulf %206, %218 : vector<8x32xf32>
    %220 = arith.addf %215, %219 : vector<8x32xf32>
    %221 = math.tanh %220 : vector<8x32xf32>
    %cst_69 = arith.constant 1.000000e+00 : f32
    %222 = vector.broadcast %cst_69 : f32 to vector<8x32xf32>
    %223 = arith.subf %222, %214 : vector<8x32xf32>
    %224 = arith.mulf %223, %221 : vector<8x32xf32>
    %225 = arith.mulf %214, %190 : vector<8x32xf32>
    %226 = arith.addf %224, %225 : vector<8x32xf32>
    %227 = vector.broadcast %14 : vector<1x32xf32> to vector<8x32xf32>
    %228 = arith.mulf %226, %227 : vector<8x32xf32>
    %cst_70 = arith.constant dense<0.000000e+00> : vector<8xf32>
    %229 = vector.multi_reduction <add>, %228, %cst_70 [1] : vector<8x32xf32> to vector<8xf32>
    %230 = vector.shape_cast %229 : vector<8xf32> to vector<8x1xf32>
    %c0_71 = arith.constant 0 : index
    %c5_72 = arith.constant 5 : index
    %231 = vector.load %arg9[%c0_71, %c5_72] : memref<8x8xf32, #tpu.memory_space<vmem>>, vector<8x1xf32>
    tpu.vector_store %arg9[%c0_71, %c5_72], %230 {strides = array<i32>} : memref<8x8xf32, #tpu.memory_space<vmem>>, vector<8x1xf32>,
    %c6 = arith.constant 6 : index
    %c0_73 = arith.constant 0 : index
    %c0_74 = arith.constant 0 : index
    %232 = vector.load %arg11[%c6, %c0_73, %c0_74] : memref<8x8x96xf32, #tpu.memory_space<vmem>>, vector<1x8x96xf32>
    %233 = vector.shape_cast %232 : vector<1x8x96xf32> to vector<8x96xf32>
    %cst_75 = arith.constant dense<0.000000e+00> : vector<8x96xf32>
    %234 = tpu.matmul %226, %12, %cst_75 {dimension_numbers = #tpu.dot_dimension_numbers<[1], [0], [0], [1], [0, 0, 1, 1], [], []>} : vector<8x32xf32>, vector<32x96xf32>, vector<8x96xf32> -> vector<8x96xf32>
    %235 = vector.extract_strided_slice %233 {offsets = [0, 0], sizes = [8, 32], strides = [1, 1]} : vector<8x96xf32> to vector<8x32xf32>
    %236 = vector.extract_strided_slice %234 {offsets = [0, 0], sizes = [8, 32], strides = [1, 1]} : vector<8x96xf32> to vector<8x32xf32>
    %237 = arith.addf %235, %236 : vector<8x32xf32>
    %238 = arith.negf %237 : vector<8x32xf32>
    %239 = math.exp %238 : vector<8x32xf32>
    %cst_76 = arith.constant 1.000000e+00 : f32
    %240 = vector.broadcast %cst_76 : f32 to vector<8x32xf32>
    %241 = arith.addf %240, %239 : vector<8x32xf32>
    %242 = arith.divf %240, %241 : vector<8x32xf32>
    %243 = vector.extract_strided_slice %233 {offsets = [0, 32], sizes = [8, 32], strides = [1, 1]} : vector<8x96xf32> to vector<8x32xf32>
    %244 = vector.extract_strided_slice %234 {offsets = [0, 32], sizes = [8, 32], strides = [1, 1]} : vector<8x96xf32> to vector<8x32xf32>
    %245 = arith.addf %243, %244 : vector<8x32xf32>
    %246 = arith.negf %245 : vector<8x32xf32>
    %247 = math.exp %246 : vector<8x32xf32>
    %cst_77 = arith.constant 1.000000e+00 : f32
    %248 = vector.broadcast %cst_77 : f32 to vector<8x32xf32>
    %249 = arith.addf %248, %247 : vector<8x32xf32>
    %250 = arith.divf %248, %249 : vector<8x32xf32>
    %251 = vector.extract_strided_slice %233 {offsets = [0, 64], sizes = [8, 32], strides = [1, 1]} : vector<8x96xf32> to vector<8x32xf32>
    %252 = vector.extract_strided_slice %234 {offsets = [0, 64], sizes = [8, 32], strides = [1, 1]} : vector<8x96xf32> to vector<8x32xf32>
    %253 = vector.broadcast %13 : vector<1x32xf32> to vector<8x32xf32>
    %254 = arith.addf %252, %253 : vector<8x32xf32>
    %255 = arith.mulf %242, %254 : vector<8x32xf32>
    %256 = arith.addf %251, %255 : vector<8x32xf32>
    %257 = math.tanh %256 : vector<8x32xf32>
    %cst_78 = arith.constant 1.000000e+00 : f32
    %258 = vector.broadcast %cst_78 : f32 to vector<8x32xf32>
    %259 = arith.subf %258, %250 : vector<8x32xf32>
    %260 = arith.mulf %259, %257 : vector<8x32xf32>
    %261 = arith.mulf %250, %226 : vector<8x32xf32>
    %262 = arith.addf %260, %261 : vector<8x32xf32>
    %263 = vector.broadcast %14 : vector<1x32xf32> to vector<8x32xf32>
    %264 = arith.mulf %262, %263 : vector<8x32xf32>
    %cst_79 = arith.constant dense<0.000000e+00> : vector<8xf32>
    %265 = vector.multi_reduction <add>, %264, %cst_79 [1] : vector<8x32xf32> to vector<8xf32>
    %266 = vector.shape_cast %265 : vector<8xf32> to vector<8x1xf32>
    %c0_80 = arith.constant 0 : index
    %c6_81 = arith.constant 6 : index
    %267 = vector.load %arg9[%c0_80, %c6_81] : memref<8x8xf32, #tpu.memory_space<vmem>>, vector<8x1xf32>
    tpu.vector_store %arg9[%c0_80, %c6_81], %266 {strides = array<i32>} : memref<8x8xf32, #tpu.memory_space<vmem>>, vector<8x1xf32>,
    %c7 = arith.constant 7 : index
    %c0_82 = arith.constant 0 : index
    %c0_83 = arith.constant 0 : index
    %268 = vector.load %arg11[%c7, %c0_82, %c0_83] : memref<8x8x96xf32, #tpu.memory_space<vmem>>, vector<1x8x96xf32>
    %269 = vector.shape_cast %268 : vector<1x8x96xf32> to vector<8x96xf32>
    %cst_84 = arith.constant dense<0.000000e+00> : vector<8x96xf32>
    %270 = tpu.matmul %262, %12, %cst_84 {dimension_numbers = #tpu.dot_dimension_numbers<[1], [0], [0], [1], [0, 0, 1, 1], [], []>} : vector<8x32xf32>, vector<32x96xf32>, vector<8x96xf32> -> vector<8x96xf32>
    %271 = vector.extract_strided_slice %269 {offsets = [0, 0], sizes = [8, 32], strides = [1, 1]} : vector<8x96xf32> to vector<8x32xf32>
    %272 = vector.extract_strided_slice %270 {offsets = [0, 0], sizes = [8, 32], strides = [1, 1]} : vector<8x96xf32> to vector<8x32xf32>
    %273 = arith.addf %271, %272 : vector<8x32xf32>
    %274 = arith.negf %273 : vector<8x32xf32>
    %275 = math.exp %274 : vector<8x32xf32>
    %cst_85 = arith.constant 1.000000e+00 : f32
    %276 = vector.broadcast %cst_85 : f32 to vector<8x32xf32>
    %277 = arith.addf %276, %275 : vector<8x32xf32>
    %278 = arith.divf %276, %277 : vector<8x32xf32>
    %279 = vector.extract_strided_slice %269 {offsets = [0, 32], sizes = [8, 32], strides = [1, 1]} : vector<8x96xf32> to vector<8x32xf32>
    %280 = vector.extract_strided_slice %270 {offsets = [0, 32], sizes = [8, 32], strides = [1, 1]} : vector<8x96xf32> to vector<8x32xf32>
    %281 = arith.addf %279, %280 : vector<8x32xf32>
    %282 = arith.negf %281 : vector<8x32xf32>
    %283 = math.exp %282 : vector<8x32xf32>
    %cst_86 = arith.constant 1.000000e+00 : f32
    %284 = vector.broadcast %cst_86 : f32 to vector<8x32xf32>
    %285 = arith.addf %284, %283 : vector<8x32xf32>
    %286 = arith.divf %284, %285 : vector<8x32xf32>
    %287 = vector.extract_strided_slice %269 {offsets = [0, 64], sizes = [8, 32], strides = [1, 1]} : vector<8x96xf32> to vector<8x32xf32>
    %288 = vector.extract_strided_slice %270 {offsets = [0, 64], sizes = [8, 32], strides = [1, 1]} : vector<8x96xf32> to vector<8x32xf32>
    %289 = vector.broadcast %13 : vector<1x32xf32> to vector<8x32xf32>
    %290 = arith.addf %288, %289 : vector<8x32xf32>
    %291 = arith.mulf %278, %290 : vector<8x32xf32>
    %292 = arith.addf %287, %291 : vector<8x32xf32>
    %293 = math.tanh %292 : vector<8x32xf32>
    %cst_87 = arith.constant 1.000000e+00 : f32
    %294 = vector.broadcast %cst_87 : f32 to vector<8x32xf32>
    %295 = arith.subf %294, %286 : vector<8x32xf32>
    %296 = arith.mulf %295, %293 : vector<8x32xf32>
    %297 = arith.mulf %286, %262 : vector<8x32xf32>
    %298 = arith.addf %296, %297 : vector<8x32xf32>
    %299 = vector.broadcast %14 : vector<1x32xf32> to vector<8x32xf32>
    %300 = arith.mulf %298, %299 : vector<8x32xf32>
    %cst_88 = arith.constant dense<0.000000e+00> : vector<8xf32>
    %301 = vector.multi_reduction <add>, %300, %cst_88 [1] : vector<8x32xf32> to vector<8xf32>
    %302 = vector.shape_cast %301 : vector<8xf32> to vector<8x1xf32>
    %c0_89 = arith.constant 0 : index
    %c7_90 = arith.constant 7 : index
    %303 = vector.load %arg9[%c0_89, %c7_90] : memref<8x8xf32, #tpu.memory_space<vmem>>, vector<8x1xf32>
    tpu.vector_store %arg9[%c0_89, %c7_90], %302 {strides = array<i32>} : memref<8x8xf32, #tpu.memory_space<vmem>>, vector<8x1xf32>,
    %c0_91 = arith.constant 0 : index
    %c0_92 = arith.constant 0 : index
    %304 = vector.load %arg10[%c0_91, %c0_92] : memref<8x32xf32, #tpu.memory_space<vmem>>, vector<8x32xf32>
    tpu.vector_store %arg10[%c0_91, %c0_92], %298 {strides = array<i32>} : memref<8x32xf32, #tpu.memory_space<vmem>>, vector<8x32xf32>,
    %c0_93 = arith.constant 0 : index
    %c0_94 = arith.constant 0 : index
    %305 = vector.load %arg9[%c0_93, %c0_94] : memref<8x8xf32, #tpu.memory_space<vmem>>, vector<8x8xf32>
    %c0_95 = arith.constant 0 : index
    %c0_96 = arith.constant 0 : index
    %306 = vector.load %arg8[%c0_95, %c0_96] : memref<1x1xf32, #tpu.memory_space<vmem>>, vector<1x1xf32>
    %307 = vector.broadcast %306 : vector<1x1xf32> to vector<8x8xf32>
    %308 = arith.addf %305, %307 : vector<8x8xf32>
    %309 = arith.negf %308 : vector<8x8xf32>
    %310 = math.exp %309 : vector<8x8xf32>
    %cst_97 = arith.constant 1.000000e+00 : f32
    %311 = vector.broadcast %cst_97 : f32 to vector<8x8xf32>
    %312 = arith.addf %311, %310 : vector<8x8xf32>
    %313 = arith.divf %311, %312 : vector<8x8xf32>
    %c0_98 = arith.constant 0 : index
    %c0_99 = arith.constant 0 : index
    %314 = vector.load %arg9[%c0_98, %c0_99] : memref<8x8xf32, #tpu.memory_space<vmem>>, vector<8x8xf32>
    tpu.vector_store %arg9[%c0_98, %c0_99], %313 {strides = array<i32>} : memref<8x8xf32, #tpu.memory_space<vmem>>, vector<8x8xf32>,
    return
  }
  func.func @transform_0(%arg0: i32, %arg1: i32) -> (i32, i32, i32) {
    %c0_i32 = arith.constant 0 : i32
    %c0_i32_0 = arith.constant 0 : i32
    return %arg1, %arg0, %c0_i32 : i32, i32, i32
  }
  func.func @transform_1(%arg0: i32, %arg1: i32) -> (i32, i32) {
    %c0_i32 = arith.constant 0 : i32
    %c0_i32_0 = arith.constant 0 : i32
    %c0_i32_1 = arith.constant 0 : i32
    return %c0_i32, %c0_i32_0 : i32, i32
  }
  func.func @transform_2(%arg0: i32, %arg1: i32) -> (i32, i32) {
    %c0_i32 = arith.constant 0 : i32
    %c0_i32_0 = arith.constant 0 : i32
    %c0_i32_1 = arith.constant 0 : i32
    return %c0_i32, %c0_i32_0 : i32, i32
  }
  func.func @transform_3(%arg0: i32, %arg1: i32) -> (i32, i32) {
    %c0_i32 = arith.constant 0 : i32
    %c0_i32_0 = arith.constant 0 : i32
    %c0_i32_1 = arith.constant 0 : i32
    return %c0_i32, %c0_i32_0 : i32, i32
  }
  func.func @transform_4(%arg0: i32, %arg1: i32) -> (i32, i32) {
    %c0_i32 = arith.constant 0 : i32
    %c0_i32_0 = arith.constant 0 : i32
    %c0_i32_1 = arith.constant 0 : i32
    return %c0_i32, %c0_i32_0 : i32, i32
  }
  func.func @transform_5(%arg0: i32, %arg1: i32) -> (i32, i32) {
    %c0_i32 = arith.constant 0 : i32
    %c0_i32_0 = arith.constant 0 : i32
    %c0_i32_1 = arith.constant 0 : i32
    return %c0_i32, %c0_i32_0 : i32, i32
  }
  func.func @transform_6(%arg0: i32, %arg1: i32) -> (i32, i32) {
    %c0_i32 = arith.constant 0 : i32
    %c0_i32_0 = arith.constant 0 : i32
    %c0_i32_1 = arith.constant 0 : i32
    return %c0_i32, %c0_i32_0 : i32, i32
  }
  func.func @transform_7(%arg0: i32, %arg1: i32) -> (i32, i32) {
    %c0_i32 = arith.constant 0 : i32
    return %arg0, %arg1 : i32, i32
  }
}

</mosaic_0001>

<bundles_post_ra>
// kernel: tpu_custom_call.1
= control target key start
LH: loop header
LB: loop body
LE: loop exit
PB: predicated region body
PF: predicated region fallthrough
CT: control target
= control target key end

     0   :  { %s1749_s0 = inlined_call_operand.vmem [shape: f32[8,8,4], index: 0, kind: input, shape index: {}]   ;;  %s1750_s1 = inlined_call_operand.vmem [shape: f32[4,96], index: 1, kind: input, shape index: {}]   ;;  %s1751_s2 = inlined_call_operand.vmem [shape: f32[32,96], index: 2, kind: input, shape index: {}]   ;;  %s1752_s3 = inlined_call_operand.vmem [shape: f32[1,96], index: 3, kind: input, shape index: {}]   ;;  %s1753_s4 = inlined_call_operand.vmem [shape: f32[1,32], index: 4, kind: input, shape index: {}]   ;;  %s1754_s5 = inlined_call_operand.vmem [shape: f32[1,32], index: 5, kind: input, shape index: {}]   ;;  %s1755_s6 = inlined_call_operand.<no memory space> [shape: f32[1,1], index: 6, kind: input, shape index: {}]   ;;  %s1756_s7 = inlined_call_operand.hbm [shape: f32[8,8], index: 7, kind: output, shape index: {}]  }
   0x1   :  { %v12_v0 = vstv %s1755_s6 }
   0x2   :  { %13 = vst [vmem:[#allocation4] sm:$0x1] %v12_v0 }
   0x3   :  { %v43_v1 = vld [vmem:[%s1750_s1] sm:$0xf]  ;;  %vm76_vm0 = vcmask 1043456   ;;  %vm51_vm1 = vcmask 31744   ;;  %v1432_v3 = vmov 0.0   ;;  %v1492_v4 = vld [vmem:[%s1751_s2 + $0x18] sm:$0xff] }
   0x4   :  { %v35_v2 = vld [vmem:[%s1749_s0] sm:$0xff]  ;;  %1248 = vmatprep.subr.msk.mxu0 %vm76_vm0, %v43_v1  ;;  %1262 = vmatprep.subr.mxu1 %v1432_v3  ;;  %v36_v5 = vld [vmem:[%s1749_s0 + $0x8] sm:$0xff]  ;;  %vm33_vm2 = vcmask 261120   ;;  %v1501_v6 = vld [vmem:[%s1751_s2 + $0x10] sm:$0xff] }
   0x5   :  { %1249 = vmatpush3.msk.msra.mxu0 %vm76_vm0, %v43_v1  ;;  %1250 = vmatprep.mubr.msk.f32.mxu0 %vm51_vm1, %v35_v2  ;;  %34 = vst.msk [vmem:[#allocation2] sm:$0xff] %vm33_vm2, %v1432_v3  ;;  %v1181_v7 = vld [vmem:[%s1753_s4] ss:$0 sm:$0xff] }
   0x6   :  { %1263 = vmatpush3.msra.mxu1 %v1492_v4  ;;  %1251 = vmatmul.mubr.msk.f32.vlgmr.msra.gmra.mxu0 %vm51_vm1, %v36_v5 }
   0x7   :  { %14 = vsyncpa [#allocation6], 0  ;;  %1264 = vmatprep.subr.mxu1 %v1432_v3  ;;  %v1514_v8 = vld [vmem:[%s1751_s2 + $0x8] sm:$0xff]  ;;  %vm1433_vm3 = vmmov 0   ;;  %s1434_s15 = smov 64   ;;  %v1524_v9 = vld [vmem:[%s1751_s2] sm:$0xff]  ;;  %1284 = vmatprep.subr.mxu0 %v1432_v3 }
   0x8   :  { %1270 = vmatprep.mubr.msk.f32.mxu1 %vm1433_vm3, %v1432_v3  ;;  %1265 = vmatpush3.msra.mxu1 %v1501_v6  ;;  %v1553_v12 = vld [vmem:[%s1752_s3] ss:$0 sm:$0xff]  ;;  %vm185_vm4 = vcmask 785408   ;;  %s1435_s3 = smov 32   ;;  %s1436_s18 = smov 96   ;;  %v37_v51 = vld [vmem:[%s1749_s0 + $0x10] sm:$0xff] }
   0x9   :  { %288 = vrot.lane.b32.xlu0 %v1181_v7, %s1434_s15  ;;  %1266 = vmatprep.subr.mxu1 %v1432_v3  ;;  %v38_v52 = vld [vmem:[%s1749_s0 + $0x18] sm:$0xff]  ;;  %v39_v53 = vld [vmem:[%s1749_s0 + $0x20] sm:$0xff]  ;;  %v40_v54 = vld [vmem:[%s1749_s0 + $0x28] sm:$0xff]  ;;  %vm330_vm5 = vcmask 7168   ;;  %vm444_vm6 = vcmask 15368   ;;  %vm558_vm7 = vcmask 23568  }
   0xa   :  { %1267 = vmatpush3.msra.mxu1 %v1514_v8  ;;  %1285 = vmatpush3.msra.mxu0 %v1492_v4  ;;  %v41_v55 = vld [vmem:[%s1749_s0 + $0x30] sm:$0xff]  ;;  %v42_v56 = vld [vmem:[%s1749_s0 + $0x38] sm:$0xff]  ;;  %vm672_vm8 = vcmask 31768   ;;  %vm786_vm9 = vcmask 39968   ;;  %vm900_vm10 = vcmask 48168   ;;  %vm1014_vm11 = vcmask 56368  }
   0xb   :  { %1268 = vmatprep.subr.mxu1 %v1432_v3  ;;  %1286 = vmatprep.subr.mxu0 %v1432_v3  ;;  %vm1128_vm12 = vcmask 64568   ;;  %vm1153_vm13 = vcmask 64512  }
   0xc   :  { %1269 = vmatpush3.msra.mxu1 %v1524_v9  ;;  %v200_v10 = vld [vmem:[#allocation2] sm:$0xff]  ;;  %1287 = vmatpush3.msra.mxu0 %v1501_v6 }
   0xd   :  { %1271 = vmatmul.mubr.msk.f32.vlgmr.msra.gmra.mxu1 %vm33_vm2, %v200_v10  ;;  %1273 = vmatprep.subr.mxu1 %v1432_v3 }
   0xe   :  { %1274 = vmatpush3.msra.mxu1 %v1492_v4  ;;  %1281 = vmatprep.mubr.msk.f32.mxu1 %vm1433_vm3, %v1432_v3 }
   0xf   :  { %1275 = vmatprep.subr.mxu1 %v1432_v3  ;;  %1288 = vmatprep.subr.mxu0 %v1432_v3 }
  0x10   :  { %1276 = vmatpush3.msra.mxu1 %v1501_v6  ;;  %1289 = vmatpush3.msra.mxu0 %v1514_v8 }
  0x11   :  { %1277 = vmatprep.subr.mxu1 %v1432_v3  ;;  %1290 = vmatprep.subr.mxu0 %v1432_v3 }
  0x12   :  { %1278 = vmatpush3.msra.mxu1 %v1514_v8  ;;  %1291 = vmatpush3.msra.mxu0 %v1524_v9 }
  0x13   :  { %1279 = vmatprep.subr.mxu1 %v1432_v3  ;;  %1306 = vmatprep.subr.mxu0 %v1432_v3 }
  0x14   :  { %1280 = vmatpush3.msra.mxu1 %v1524_v9  ;;  %1253 = vmatprep.mubr.msk.f32.mxu0 %vm51_vm1, %v37_v51 }
  0x15   :  { %1295 = vmatprep.subr.mxu1 %v1432_v3  ;;  %1254 = vmatmul.mubr.msk.f32.gmra.mxu0 %vm51_vm1, %v38_v52 }
  0x16   :  { %1256 = vmatprep.mubr.msk.f32.mxu0 %vm51_vm1, %v39_v53 }
  0x19   :  { %1257 = vmatmul.mubr.msk.f32.gmra.mxu0 %vm51_vm1, %v40_v54 }
  0x1a   :  { %1259 = vmatprep.mubr.msk.f32.mxu0 %vm51_vm1, %v41_v55 }
  0x1d   :  { %1260 = vmatmul.mubr.msk.f32.gmra.mxu0 %vm51_vm1, %v42_v56 }
  0x1e   :  { %1292 = vmatprep.mubr.msk.f32.mxu0 %vm1433_vm3, %v1432_v3 }
  0x7b   :  { %v1559_v16 = vpop.permute.xlu0 %288 }
  0xc6   :  { %v1252_v11 = vpop.f32.mrf.mxu0 }
  0xc7   :  { %v152_v13 = vadd.f32 %v1252_v11, %v1553_v12 }
  0xc8   :  { %v146_v14 = vpop.f32.mrf.mxu0 }
  0xc9   :  { %187 = vst.msk [vmem:[#allocation3 + $0x8] sm:$0xff] %vm185_vm4, %v152_v13  ;;  %v147_v15 = vadd.f32 %v1553_v12, %v146_v14 }
  0xcb   :  { %186 = vst.msk [vmem:[#allocation3] sm:$0xff] %vm185_vm4, %v147_v15 }
  0xcd   :  { %v272_v17 = vpop.f32.mrf.mxu1 }
  0xce   :  { %v291_v18 = vadd.f32 %v1559_v16, %v272_v17 }
  0xcf   :  { %v1272_v19 = vpop.f32.mrf.mxu1 }
  0xd0   :  { %293 = vrot.lane.b32.xlu0 %v291_v18, %s1434_s15  ;;  %v333_v41 = vld [vmem:[#allocation3 + $0x8] sm:$0xff] }
  0xd2   :  { %v201_v20 = vld [vmem:[#allocation3] sm:$0xff] }
  0xd3   :  { %v276_v21 = vadd.f32 %v272_v17, %v201_v20 }
  0xd4   :  { %309 = vrot.lane.b32.xlu0 %v200_v10, %s1435_s3 }
  0xd5   :  { %v1180_v22 = vmul.f32 -1.442695, %v276_v21  ;;  %v1255_v63 = vpop.f32.mrf.mxu0 }
  0xd6   :  { %v162_v0 = vadd.f32 %v1255_v63, %v1553_v12 }
  0xd7   :  { %1358 = vpow2.f32 %v1180_v22  ;;  %v156_v1 = vpop.f32.mrf.mxu0 }
  0xd8   :  { %189 = vst.msk [vmem:[#allocation3 + $0x18] sm:$0xff] %vm185_vm4, %v162_v0  ;;  %v157_v2 = vadd.f32 %v1553_v12, %v156_v1 }
  0xd9   :  { %v1258_v5 = vpop.f32.mrf.mxu0 }
  0xda   :  { %188 = vst.msk [vmem:[#allocation3 + $0x10] sm:$0xff] %vm185_vm4, %v157_v2  ;;  %v172_v7 = vadd.f32 %v1258_v5, %v1553_v12 }
  0xdb   :  { %v166_v10 = vpop.f32.mrf.mxu0 }
  0xdc   :  { %191 = vst.msk [vmem:[#allocation3 + $0x28] sm:$0xff] %vm185_vm4, %v172_v7  ;;  %v167_v11 = vadd.f32 %v1553_v12, %v166_v10 }
  0xdd   :  { %v1261_v13 = vpop.f32.mrf.mxu0 }
  0xde   :  { %190 = vst.msk [vmem:[#allocation3 + $0x20] sm:$0xff] %vm185_vm4, %v167_v11  ;;  %v182_v14 = vadd.f32 %v1261_v13, %v1553_v12 }
  0xdf   :  { %v176_v15 = vpop.f32.mrf.mxu0 }
  0xe0   :  { %193 = vst.msk [vmem:[#allocation3 + $0x38] sm:$0xff] %vm185_vm4, %v182_v14  ;;  %v177_v17 = vadd.f32 %v1553_v12, %v176_v15 }
  0xe1   :  { %v447_v21 = vld [vmem:[#allocation3 + $0x10] sm:$0xff] }
  0xe2   :  { %192 = vst.msk [vmem:[#allocation3 + $0x30] sm:$0xff] %vm185_vm4, %v177_v17 }
  0xe4   :  { %v1359_v23 = vpop.eup %1358 }
  0xe5   :  { %v280_v24 = vadd.f32 1.0, %v1359_v23  ;;  %v675_v63 = vld [vmem:[#allocation3 + $0x20] sm:$0xff] }
  0xe7   :  { %1360 = vrcp.f32 %v280_v24 }
  0xf4   :  { %v1361_v25 = vpop.eup %1360 }
  0xf5   :  { %v303_v32 = vsub.f32 1.0, %v1361_v25 }
 0x142   :  { %v294_v26 = vpop.permute.xlu0 %293 }
 0x143   :  { %v296_v27 = vmul.f32 %v1361_v25, %v294_v26 }
 0x145   :  { %298 = vrot.lane.b32.xlu1 %v296_v27, %s1434_s15 }
 0x146   :  { %v310_v31 = vpop.permute.xlu0 %309 }
 0x147   :  { %v312_v34 = vmul.f32 %v1361_v25, %v310_v31 }
 0x1b7   :  { %v299_v28 = vpop.permute.xlu1 %298 }
 0x1b8   :  { %v301_v29 = vadd.f32 %v299_v28, %v201_v20 }
 0x1ba   :  { %1362 = vtanh.f32 %v301_v29 }
 0x1c7   :  { %v1363_v30 = vpop.eup %1362 }
 0x1c8   :  { %305 = vrot.lane.b32.xlu1 %v1363_v30, %s1436_s18 }
 0x23a   :  { %v306_v33 = vpop.permute.xlu1 %305 }
 0x23b   :  { %v308_v35 = vmul.f32 %v306_v33, %v303_v32 }
 0x23d   :  { %v1566_v36 = vadd.f32 %v312_v34, %v308_v35 }
 0x23f   :  { %335 = vrot.lane.b32.xlu1 %v1566_v36, %s1436_s18 }
 0x2b1   :  { %v336_v37 = vpop.permute.xlu1 %335 }
 0x2b2   :  { %1282 = vmatmul.mubr.msk.f32.vlgmr.msra.gmra.mxu1 %vm33_vm2, %v336_v37 }
 0x2b3   :  { %1296 = vmatpush3.msra.mxu1 %v1492_v4  ;;  %1303 = vmatprep.mubr.msk.f32.mxu1 %vm1433_vm3, %v1432_v3 }
 0x2b4   :  { %1297 = vmatprep.subr.mxu1 %v1432_v3 }
 0x2b5   :  { %1298 = vmatpush3.msra.mxu1 %v1501_v6 }
 0x2b6   :  { %1299 = vmatprep.subr.mxu1 %v1432_v3 }
 0x2b7   :  { %1300 = vmatpush3.msra.mxu1 %v1514_v8 }
 0x2b8   :  { %1301 = vmatprep.subr.mxu1 %v1432_v3 }
 0x2b9   :  { %1302 = vmatpush3.msra.mxu1 %v1524_v9 }
 0x2ba   :  { %1317 = vmatprep.subr.mxu1 %v1432_v3 }
 0x372   :  { %v405_v38 = vpop.f32.mrf.mxu1 }
 0x373   :  { %v416_v39 = vadd.f32 %v405_v38, %v1559_v16  ;;  %v409_v42 = vadd.f32 %v405_v38, %v333_v41 }
 0x374   :  { %v1283_v40 = vpop.f32.mrf.mxu1 }
 0x375   :  { %418 = vrot.lane.b32.xlu0 %v416_v39, %s1434_s15  ;;  %v1184_v43 = vmul.f32 -1.442695, %v409_v42  ;;  %v561_v42 = vld [vmem:[#allocation3 + $0x18] sm:$0xff] }
 0x377   :  { %1364 = vpow2.f32 %v1184_v43 }
 0x384   :  { %v1365_v44 = vpop.eup %1364 }
 0x385   :  { %v413_v45 = vadd.f32 1.0, %v1365_v44 }
 0x387   :  { %1366 = vrcp.f32 %v413_v45 }
 0x394   :  { %v1367_v46 = vpop.eup %1366 }
 0x395   :  { %v428_v58 = vsub.f32 1.0, %v1367_v46  ;;  %v434_v60 = vmul.f32 %v1367_v46, %v1566_v36 }
 0x3e7   :  { %v419_v47 = vpop.permute.xlu0 %418 }
 0x3e8   :  { %v421_v48 = vmul.f32 %v1367_v46, %v419_v47 }
 0x3ea   :  { %423 = vrot.lane.b32.xlu1 %v421_v48, %s1434_s15 }
 0x45c   :  { %v424_v49 = vpop.permute.xlu1 %423 }
 0x45d   :  { %v426_v50 = vadd.f32 %v424_v49, %v333_v41 }
 0x45f   :  { %1368 = vtanh.f32 %v426_v50 }
 0x46c   :  { %v1369_v57 = vpop.eup %1368 }
 0x46d   :  { %430 = vrot.lane.b32.xlu0 %v1369_v57, %s1436_s18 }
 0x4df   :  { %v431_v59 = vpop.permute.xlu0 %430 }
 0x4e0   :  { %v433_v61 = vmul.f32 %v431_v59, %v428_v58 }
 0x4e2   :  { %v1612_v62 = vadd.f32 %v434_v60, %v433_v61 }
 0x4e4   :  { %449 = vrot.lane.b32.xlu1 %v1612_v62, %s1436_s18 }
 0x556   :  { %v450_v18 = vpop.permute.xlu1 %449 }
 0x557   :  { %1293 = vmatmul.mubr.msk.f32.vlgmr.msra.gmra.mxu0 %vm33_vm2, %v450_v18 }
 0x558   :  { %1307 = vmatpush3.msra.mxu0 %v1492_v4  ;;  %1314 = vmatprep.mubr.msk.f32.mxu0 %vm1433_vm3, %v1432_v3 }
 0x559   :  { %1308 = vmatprep.subr.mxu0 %v1432_v3 }
 0x55a   :  { %1309 = vmatpush3.msra.mxu0 %v1501_v6 }
 0x55b   :  { %1310 = vmatprep.subr.mxu0 %v1432_v3 }
 0x55c   :  { %1311 = vmatpush3.msra.mxu0 %v1514_v8 }
 0x55d   :  { %1312 = vmatprep.subr.mxu0 %v1432_v3 }
 0x55e   :  { %1313 = vmatpush3.msra.mxu0 %v1524_v9 }
 0x55f   :  { %1328 = vmatprep.subr.mxu0 %v1432_v3 }
 0x617   :  { %v519_v12 = vpop.f32.mrf.mxu0 }
 0x618   :  { %v530_v19 = vadd.f32 %v519_v12, %v1559_v16  ;;  %v523_v22 = vadd.f32 %v519_v12, %v447_v21 }
 0x619   :  { %v1294_v20 = vpop.f32.mrf.mxu0 }
 0x61a   :  { %532 = vrot.lane.b32.xlu0 %v530_v19, %s1434_s15  ;;  %v1186_v23 = vmul.f32 -1.442695, %v523_v22 }
 0x61c   :  { %1370 = vpow2.f32 %v1186_v23 }
 0x629   :  { %v1371_v24 = vpop.eup %1370 }
 0x62a   :  { %v527_v25 = vadd.f32 1.0, %v1371_v24 }
 0x62c   :  { %1372 = vrcp.f32 %v527_v25 }
 0x639   :  { %v1373_v26 = vpop.eup %1372 }
 0x63a   :  { %v542_v32 = vsub.f32 1.0, %v1373_v26  ;;  %v548_v34 = vmul.f32 %v1373_v26, %v1612_v62 }
 0x68c   :  { %v533_v27 = vpop.permute.xlu0 %532 }
 0x68d   :  { %v535_v28 = vmul.f32 %v1373_v26, %v533_v27 }
 0x68f   :  { %537 = vrot.lane.b32.xlu1 %v535_v28, %s1434_s15 }
 0x701   :  { %v538_v29 = vpop.permute.xlu1 %537 }
 0x702   :  { %v540_v30 = vadd.f32 %v538_v29, %v447_v21 }
 0x704   :  { %1374 = vtanh.f32 %v540_v30 }
 0x711   :  { %v1375_v31 = vpop.eup %1374 }
 0x712   :  { %544 = vrot.lane.b32.xlu0 %v1375_v31, %s1436_s18 }
 0x784   :  { %v545_v33 = vpop.permute.xlu0 %544 }
 0x785   :  { %v547_v35 = vmul.f32 %v545_v33, %v542_v32 }
 0x787   :  { %v1644_v37 = vadd.f32 %v548_v34, %v547_v35 }
 0x789   :  { %563 = vrot.lane.b32.xlu1 %v1644_v37, %s1436_s18 }
 0x7fb   :  { %v564_v38 = vpop.permute.xlu1 %563 }
 0x7fc   :  { %1304 = vmatmul.mubr.msk.f32.vlgmr.msra.gmra.mxu1 %vm33_vm2, %v564_v38 }
 0x7fd   :  { %1318 = vmatpush3.msra.mxu1 %v1492_v4  ;;  %1325 = vmatprep.mubr.msk.f32.mxu1 %vm1433_vm3, %v1432_v3 }
 0x7fe   :  { %1319 = vmatprep.subr.mxu1 %v1432_v3 }
 0x7ff   :  { %1320 = vmatpush3.msra.mxu1 %v1501_v6 }
 0x800   :  { %1321 = vmatprep.subr.mxu1 %v1432_v3 }
 0x801   :  { %1322 = vmatpush3.msra.mxu1 %v1514_v8 }
 0x802   :  { %1323 = vmatprep.subr.mxu1 %v1432_v3 }
 0x803   :  { %1324 = vmatpush3.msra.mxu1 %v1524_v9 }
 0x804   :  { %1339 = vmatprep.subr.mxu1 %v1432_v3 }
 0x8bc   :  { %v633_v39 = vpop.f32.mrf.mxu1 }
 0x8bd   :  { %v644_v40 = vadd.f32 %v633_v39, %v1559_v16  ;;  %v637_v43 = vadd.f32 %v633_v39, %v561_v42 }
 0x8be   :  { %v1305_v41 = vpop.f32.mrf.mxu1 }
 0x8bf   :  { %646 = vrot.lane.b32.xlu0 %v644_v40, %s1434_s15  ;;  %v1188_v44 = vmul.f32 -1.442695, %v637_v43 }
 0x8c1   :  { %1376 = vpow2.f32 %v1188_v44 }
 0x8ce   :  { %v1377_v45 = vpop.eup %1376 }
 0x8cf   :  { %v641_v46 = vadd.f32 1.0, %v1377_v45 }
 0x8d1   :  { %1378 = vrcp.f32 %v641_v46 }
 0x8de   :  { %v1379_v47 = vpop.eup %1378 }
 0x8df   :  { %v656_v53 = vsub.f32 1.0, %v1379_v47  ;;  %v662_v55 = vmul.f32 %v1379_v47, %v1644_v37 }
 0x931   :  { %v647_v48 = vpop.permute.xlu0 %646 }
 0x932   :  { %v649_v49 = vmul.f32 %v1379_v47, %v647_v48 }
 0x934   :  { %651 = vrot.lane.b32.xlu1 %v649_v49, %s1434_s15 }
 0x9a6   :  { %v652_v50 = vpop.permute.xlu1 %651 }
 0x9a7   :  { %v654_v51 = vadd.f32 %v652_v50, %v561_v42  ;;  %v903_v42 = vld [vmem:[#allocation3 + $0x30] sm:$0xff] }
 0x9a9   :  { %1380 = vtanh.f32 %v654_v51 }
 0x9b6   :  { %v1381_v52 = vpop.eup %1380 }
 0x9b7   :  { %658 = vrot.lane.b32.xlu0 %v1381_v52, %s1436_s18 }
 0xa29   :  { %v659_v54 = vpop.permute.xlu0 %658 }
 0xa2a   :  { %v661_v56 = vmul.f32 %v659_v54, %v656_v53 }
 0xa2c   :  { %v1664_v57 = vadd.f32 %v662_v55, %v661_v56 }
 0xa2e   :  { %677 = vrot.lane.b32.xlu1 %v1664_v57, %s1436_s18 }
 0xaa0   :  { %v678_v58 = vpop.permute.xlu1 %677 }
 0xaa1   :  { %1315 = vmatmul.mubr.msk.f32.vlgmr.msra.gmra.mxu0 %vm33_vm2, %v678_v58 }
 0xaa2   :  { %1329 = vmatpush3.msra.mxu0 %v1492_v4  ;;  %1336 = vmatprep.mubr.msk.f32.mxu0 %vm1433_vm3, %v1432_v3 }
 0xaa3   :  { %1330 = vmatprep.subr.mxu0 %v1432_v3 }
 0xaa4   :  { %1331 = vmatpush3.msra.mxu0 %v1501_v6 }
 0xaa5   :  { %1332 = vmatprep.subr.mxu0 %v1432_v3 }
 0xaa6   :  { %1333 = vmatpush3.msra.mxu0 %v1514_v8 }
 0xaa7   :  { %1334 = vmatprep.subr.mxu0 %v1432_v3 }
 0xaa8   :  { %1335 = vmatpush3.msra.mxu0 %v1524_v9 }
 0xb61   :  { %v747_v59 = vpop.f32.mrf.mxu0 }
 0xb62   :  { %v758_v60 = vadd.f32 %v747_v59, %v1559_v16  ;;  %v751_v0 = vadd.f32 %v747_v59, %v675_v63 }
 0xb63   :  { %v1316_v61 = vpop.f32.mrf.mxu0 }
 0xb64   :  { %760 = vrot.lane.b32.xlu0 %v758_v60, %s1434_s15  ;;  %v1190_v1 = vmul.f32 -1.442695, %v751_v0  ;;  %v1182_v0 = vld [vmem:[%s1754_s5] ss:$0 sm:$0xff]  ;;  %s1438_s5 = smov [#allocation5]  }
 0xb65   :  { %s1161_s6 = sshll.u32 %s1438_s5, 4  ;;  %s1162_s6 = int_to_ptr.vmem [resolvable:$true] %s1161_s6 }
 0xb66   :  { %1382 = vpow2.f32 %v1190_v1  ;;  %v1017_v1 = vld [vmem:[#allocation3 + $0x38] sm:$0xff]  ;;  %s1410_s9 = scalar_lea.vmem %s1162_s6, 128  ;;  %p1415_p1 = scmp.lt.s32.totalorder %s1162_s6, %s1162_s6 }
 0xb67   :  { %p1411_p0 = scmp.ne.s32.totalorder %s1162_s6, %s1410_s9  ;;  %p1416_p2 = scmp.lt.s32.totalorder %s1410_s9, %s1410_s9 }
 0xb69   :  { %p1417_p3 = por %p1416_p2, %p1415_p1 }
 0xb6b   :  { %p1418_p4 = pnand %p1417_p3, %p1411_p0 }
 0xb73   :  { %v1383_v2 = vpop.eup %1382 }
 0xb74   :  { %v755_v5 = vadd.f32 1.0, %v1383_v2 }
 0xb76   :  { %1384 = vrcp.f32 %v755_v5 }
 0xb83   :  { %v1385_v7 = vpop.eup %1384 }
 0xb84   :  { %v770_v17 = vsub.f32 1.0, %v1385_v7  ;;  %v776_v12 = vmul.f32 %v1385_v7, %v1664_v57 }
 0xbd6   :  { %v761_v10 = vpop.permute.xlu0 %760 }
 0xbd7   :  { %v763_v11 = vmul.f32 %v1385_v7, %v761_v10 }
 0xbd9   :  { %765 = vrot.lane.b32.xlu1 %v763_v11, %s1434_s15 }
 0xc4b   :  { %v766_v13 = vpop.permute.xlu1 %765 }
 0xc4c   :  { %v768_v14 = vadd.f32 %v766_v13, %v675_v63 }
 0xc4e   :  { %1386 = vtanh.f32 %v768_v14 }
 0xc5b   :  { %v1387_v15 = vpop.eup %1386 }
 0xc5c   :  { %772 = vrot.lane.b32.xlu0 %v1387_v15, %s1436_s18 }
 0xcce   :  { %v773_v18 = vpop.permute.xlu0 %772 }
 0xccf   :  { %v775_v19 = vmul.f32 %v773_v18, %v770_v17 }
 0xcd1   :  { %v1683_v20 = vadd.f32 %v776_v12, %v775_v19 }
 0xcd3   :  { %791 = vrot.lane.b32.xlu1 %v1683_v20, %s1436_s18 }
 0xd45   :  { %v792_v21 = vpop.permute.xlu1 %791 }
 0xd46   :  { %1326 = vmatmul.mubr.msk.f32.vlgmr.msra.gmra.mxu1 %vm33_vm2, %v792_v21 }
 0xd47   :  { %1340 = vmatpush3.msra.mxu1 %v1492_v4  ;;  %1347 = vmatprep.mubr.msk.f32.mxu1 %vm1433_vm3, %v1432_v3  ;;  %v789_v4 = vld [vmem:[#allocation3 + $0x28] sm:$0xff] }
 0xd48   :  { %1341 = vmatprep.subr.mxu1 %v1432_v3 }
 0xd49   :  { %1342 = vmatpush3.msra.mxu1 %v1501_v6 }
 0xd4a   :  { %1343 = vmatprep.subr.mxu1 %v1432_v3 }
 0xd4b   :  { %1344 = vmatpush3.msra.mxu1 %v1514_v8 }
 0xd4c   :  { %1345 = vmatprep.subr.mxu1 %v1432_v3 }
 0xd4d   :  { %1346 = vmatpush3.msra.mxu1 %v1524_v9 }
 0xe06   :  { %v861_v22 = vpop.f32.mrf.mxu1 }
 0xe07   :  { %v872_v23 = vadd.f32 %v861_v22, %v1559_v16  ;;  %v865_v25 = vadd.f32 %v861_v22, %v789_v4 }
 0xe08   :  { %v1327_v24 = vpop.f32.mrf.mxu1 }
 0xe09   :  { %874 = vrot.lane.b32.xlu0 %v872_v23, %s1434_s15  ;;  %v1192_v26 = vmul.f32 -1.442695, %v865_v25 }
 0xe0b   :  { %1388 = vpow2.f32 %v1192_v26 }
 0xe18   :  { %v1389_v27 = vpop.eup %1388 }
 0xe19   :  { %v869_v6 = vadd.f32 1.0, %v1389_v27 }
 0xe1b   :  { %1390 = vrcp.f32 %v869_v6 }
 0xe28   :  { %v1391_v28 = vpop.eup %1390 }
 0xe29   :  { %v884_v31 = vsub.f32 1.0, %v1391_v28  ;;  %v890_v33 = vmul.f32 %v1391_v28, %v1683_v20 }
 0xe7b   :  { %v875_v29 = vpop.permute.xlu0 %874 }
 0xe7c   :  { %v877_v8 = vmul.f32 %v1391_v28, %v875_v29 }
 0xe7e   :  { %879 = vrot.lane.b32.xlu1 %v877_v8, %s1434_s15 }
 0xef0   :  { %v880_v3 = vpop.permute.xlu1 %879 }
 0xef1   :  { %v882_v9 = vadd.f32 %v880_v3, %v789_v4 }
 0xef3   :  { %1392 = vtanh.f32 %v882_v9 }
 0xf00   :  { %v1393_v30 = vpop.eup %1392 }
 0xf01   :  { %886 = vrot.lane.b32.xlu0 %v1393_v30, %s1436_s18 }
 0xf73   :  { %v887_v32 = vpop.permute.xlu0 %886 }
 0xf74   :  { %v889_v34 = vmul.f32 %v887_v32, %v884_v31 }
 0xf76   :  { %v1702_v35 = vadd.f32 %v890_v33, %v889_v34 }
 0xf78   :  { %905 = vrot.lane.b32.xlu1 %v1702_v35, %s1436_s18 }
 0xfea   :  { %v906_v38 = vpop.permute.xlu1 %905 }
 0xfeb   :  { %1337 = vmatmul.mubr.msk.f32.vlgmr.msra.gmra.mxu0 %vm33_vm2, %v906_v38 }
0x10ab   :  { %v975_v39 = vpop.f32.mrf.mxu0 }
0x10ac   :  { %v986_v40 = vadd.f32 %v975_v39, %v1559_v16  ;;  %v979_v43 = vadd.f32 %v975_v39, %v903_v42 }
0x10ad   :  { %v1338_v41 = vpop.f32.mrf.mxu0 }
0x10ae   :  { %988 = vrot.lane.b32.xlu0 %v986_v40, %s1434_s15  ;;  %v1194_v44 = vmul.f32 -1.442695, %v979_v43  ;;  %v1197_v43 = vld [vmem:[#allocation4] ss:$0 sm:$0xff] }
0x10b0   :  { %1394 = vpow2.f32 %v1194_v44 }
0x10bd   :  { %v1395_v45 = vpop.eup %1394 }
0x10be   :  { %v983_v46 = vadd.f32 1.0, %v1395_v45 }
0x10c0   :  { %1396 = vrcp.f32 %v983_v46 }
0x10cd   :  { %v1397_v47 = vpop.eup %1396 }
0x10ce   :  { %v998_v53 = vsub.f32 1.0, %v1397_v47  ;;  %v1004_v55 = vmul.f32 %v1397_v47, %v1702_v35 }
0x1120   :  { %v989_v48 = vpop.permute.xlu0 %988 }
0x1121   :  { %v991_v49 = vmul.f32 %v1397_v47, %v989_v48 }
0x1123   :  { %993 = vrot.lane.b32.xlu1 %v991_v49, %s1434_s15 }
0x1195   :  { %v994_v50 = vpop.permute.xlu1 %993 }
0x1196   :  { %v996_v51 = vadd.f32 %v994_v50, %v903_v42 }
0x1198   :  { %1398 = vtanh.f32 %v996_v51 }
0x11a5   :  { %v1399_v52 = vpop.eup %1398 }
0x11a6   :  { %1000 = vrot.lane.b32.xlu0 %v1399_v52, %s1436_s18 }
0x1218   :  { %v1001_v54 = vpop.permute.xlu0 %1000 }
0x1219   :  { %v1003_v56 = vmul.f32 %v1001_v54, %v998_v53 }
0x121b   :  { %v1005_v58 = vadd.f32 %v1004_v55, %v1003_v56 }
0x121d   :  { %1019 = vrot.lane.b32.xlu1 %v1005_v58, %s1436_s18 }
0x128f   :  { %v1020_v59 = vpop.permute.xlu1 %1019 }
0x1290   :  { %1348 = vmatmul.mubr.msk.f32.vlgmr.msra.gmra.mxu1 %vm33_vm2, %v1020_v59 }
0x1350   :  { %v1089_v60 = vpop.f32.mrf.mxu1 }
0x1351   :  { %v1100_v61 = vadd.f32 %v1089_v60, %v1559_v16  ;;  %v1093_v2 = vadd.f32 %v1089_v60, %v1017_v1 }
0x1352   :  { %v1349_v63 = vpop.f32.mrf.mxu1 }
0x1353   :  { %1102 = vrot.lane.b32.xlu0 %v1100_v61, %s1434_s15  ;;  %v1196_v5 = vmul.f32 -1.442695, %v1093_v2 }
0x1355   :  { %1400 = vpow2.f32 %v1196_v5 }
0x1357   :  { %319 = vrot.lane.b32.xlu0 %v1182_v0, %s1435_s3 }
0x1362   :  { %v1401_v7 = vpop.eup %1400 }
0x1363   :  { %v1097_v10 = vadd.f32 1.0, %v1401_v7 }
0x1365   :  { %1402 = vrcp.f32 %v1097_v10 }
0x1372   :  { %v1403_v11 = vpop.eup %1402 }
0x1373   :  { %v1112_v27 = vsub.f32 1.0, %v1403_v11  ;;  %v1118_v28 = vmul.f32 %v1403_v11, %v1005_v58 }
0x13c5   :  { %v1103_v13 = vpop.permute.xlu0 %1102 }
0x13c6   :  { %v1105_v14 = vmul.f32 %v1403_v11, %v1103_v13 }
0x13c8   :  { %1107 = vrot.lane.b32.xlu1 %v1105_v14, %s1434_s15 }
0x13c9   :  { %v320_v16 = vpop.permute.xlu0 %319 }
0x13ca   :  { %v322_v15 = vmul.f32 %v320_v16, %v1566_v36  ;;  %v436_v17 = vmul.f32 %v1612_v62, %v320_v16  ;;  %v664_v24 = vmul.f32 %v1664_v57, %v320_v16  ;;  %v1006_v36 = vmul.f32 %v1005_v58, %v320_v16 }
0x13cb   :  { %v550_v4 = vmul.f32 %v1644_v37, %v320_v16  ;;  %v778_v25 = vmul.f32 %v1683_v20, %v320_v16  ;;  %v892_v26 = vmul.f32 %v1702_v35, %v320_v16  ;;  %v1437_v57 = vmov 0  }
0x13cc   :  { %324 = vrot.lane.b32.xlu0 %v322_v15, %s1436_s18 }
0x13cd   :  { %1357 = vset.pattern.permute.xlu0 %v1437_v57 }
0x13d0   :  { %438 = vrot.lane.b32.xlu0 %v436_v17, %s1436_s18 }
0x143a   :  { %v1108_v18 = vpop.permute.xlu1 %1107 }
0x143b   :  { %v1110_v12 = vadd.f32 %v1108_v18, %v1017_v1 }
0x143d   :  { %1404 = vtanh.f32 %v1110_v12 }
0x143e   :  { %v325_v19 = vpop.permute.xlu0 %324 }
0x143f   :  { %v327_v62 = vsel %vm33_vm2, %v325_v19, 0.0 }
0x1442   :  { %v439_v21 = vpop.permute.xlu0 %438 }
0x1443   :  { %v441_v22 = vsel %vm33_vm2, %v439_v21, 0.0 }
0x1444   :  { %442 = vadd.xlane.f32.xlu0 %v441_v22 }
0x144a   :  { %v1405_v23 = vpop.eup %1404 }
0x144b   :  { %1114 = vrot.lane.b32.xlu1 %v1405_v23, %s1436_s18 }
0x145a   :  { %666 = vrot.lane.b32.xlu0 %v664_v24, %s1436_s18 }
0x145e   :  { %1008 = vrot.lane.b32.xlu0 %v1006_v36, %s1436_s18 }
0x146f   :  { %328 = vadd.xlane.f32.xlu1 %v327_v62 }
0x1480   :  { %552 = vrot.lane.b32.xlu1 %v550_v4, %s1436_s18 }
0x1484   :  { %780 = vrot.lane.b32.xlu1 %v778_v25, %s1436_s18 }
0x1488   :  { %894 = vrot.lane.b32.xlu1 %v892_v26, %s1436_s18 }
0x14bd   :  { %v1115_v6 = vpop.permute.xlu1 %1114 }
0x14be   :  { %v1117_v29 = vmul.f32 %v1115_v6, %v1112_v27 }
0x14c0   :  { %v1119_v8 = vadd.f32 %v1118_v28, %v1117_v29 }
0x14c2   :  { %v1120_v3 = vmul.f32 %v1119_v8, %v320_v16 }
0x14c4   :  { %1122 = vrot.lane.b32.xlu1 %v1120_v3, %s1436_s18 }
0x14cd   :  { %v443_v37 = vpop.xlane.xlu0 %442 }
0x14d1   :  { %v667_v9 = vpop.permute.xlu0 %666 }
0x14d2   :  { %v669_v20 = vsel %vm33_vm2, %v667_v9, 0.0 }
0x14d5   :  { %v1009_v30 = vpop.permute.xlu0 %1008 }
0x14d6   :  { %v1011_v31 = vsel %vm33_vm2, %v1009_v30, 0.0 }
0x14e8   :  { %670 = vadd.xlane.f32.xlu1 %v669_v20 }
0x14ec   :  { %1012 = vadd.xlane.f32.xlu1 %v1011_v31 }
0x14f8   :  { %v329_v32 = vpop.xlane.xlu1 %328 }
0x14f9   :  { %331 = vst.msk [vmem:[#allocation5] sm:$0xff] %vm330_vm5, %v329_v32 }
0x14fa   :  { %445 = vst.msk [vmem:[#allocation5] sm:$0xff] %vm444_vm6, %v443_v37 }
0x14fc   :  { %v553_v33 = vpop.permute.xlu1 %552 }
0x14fd   :  { %1131 = vrot.lane.b32.xlu1 %v1119_v8, %s1436_s18  ;;  %v555_v34 = vsel %vm33_vm2, %v553_v33, 0.0 }
0x14fe   :  { %556 = vadd.xlane.f32.xlu0 %v555_v34 }
0x1500   :  { %v781_v35 = vpop.permute.xlu1 %780 }
0x1501   :  { %v783_v38 = vsel %vm33_vm2, %v781_v35, 0.0 }
0x1502   :  { %784 = vadd.xlane.f32.xlu0 %v783_v38 }
0x1504   :  { %v895_v39 = vpop.permute.xlu1 %894 }
0x1505   :  { %v897_v40 = vsel %vm33_vm2, %v895_v39, 0.0 }
0x1506   :  { %898 = vadd.xlane.f32.xlu0 %v897_v40 }
0x1536   :  { %v1123_v41 = vpop.permute.xlu1 %1122 }
0x1537   :  { %v1125_v42 = vsel %vm33_vm2, %v1123_v41, 0.0 }
0x1538   :  { %1126 = vadd.xlane.f32.xlu0 %v1125_v42 }
0x154e   :  { %1143 = vperm.xlu0 %1357, %v1197_v43  }
0x1571   :  { %v671_v44 = vpop.xlane.xlu1 %670 }
0x1575   :  { %v1013_v45 = vpop.xlane.xlu1 %1012 }
0x1579   :  { %v1132_v46 = vpop.permute.xlu1 %1131 }
0x157a   :  { %1134 = vst.msk [vmem:[#allocation2] sm:$0xff] %vm33_vm2, %v1132_v46 }
0x1587   :  { %v557_v47 = vpop.xlane.xlu0 %556 }
0x1588   :  { %559 = vst.msk [vmem:[#allocation5] sm:$0xff] %vm558_vm7, %v557_v47 }
0x1589   :  { %673 = vst.msk [vmem:[#allocation5] sm:$0xff] %vm672_vm8, %v671_v44 }
0x158b   :  { %v785_v48 = vpop.xlane.xlu0 %784 }
0x158c   :  { %787 = vst.msk [vmem:[#allocation5] sm:$0xff] %vm786_vm9, %v785_v48 }
0x158f   :  { %v899_v49 = vpop.xlane.xlu0 %898 }
0x1590   :  { %901 = vst.msk [vmem:[#allocation5] sm:$0xff] %vm900_vm10, %v899_v49 }
0x1591   :  { %1015 = vst.msk [vmem:[#allocation5] sm:$0xff] %vm1014_vm11, %v1013_v45 }
0x15c1   :  { %v1127_v50 = vpop.xlane.xlu0 %1126 }
0x15c2   :  { %1129 = vst.msk [vmem:[#allocation5] sm:$0xff] %vm1128_vm12, %v1127_v50 }
0x15c9   :  { %v1144_v51 = vpop.permute.xlu0 %1143  ;;  %v1135_v52 = vld [vmem:[#allocation5] sm:$0xff] }
0x15ca   :  { %v1146_v53 = vadd.f32 %v1144_v51, %v1135_v52 }
0x15cc   :  { %v1198_v54 = vmul.f32 -1.442695, %v1146_v53 }
0x15ce   :  { %1406 = vpow2.f32 %v1198_v54 }
0x15db   :  { %v1407_v55 = vpop.eup %1406 }
0x15dc   :  { %v1150_v56 = vadd.f32 1.0, %v1407_v55 }
0x15de   :  { %1408 = vrcp.f32 %v1150_v56 }
0x15eb   :  { %v1409_v58 = vpop.eup %1408 }
0x15ec   :  { %1154 = vst.msk [vmem:[#allocation5] sm:$0xff] %vm1153_vm13, %v1409_v58 }
0x15ed   :  { %1421 = shalt.err (!%p1418_p4)
}
0x15ee   :  { %1164 = dma.vmem_to_hbm [thread:$0]  %s1162_s6, 128, %s1756_s7, [#allocation6]  }
0x15ef   :  { %1430 = dma.done.wait [#allocation6], 128  }
0x15f0   :  { %1431 = vsyncadd [#allocation6], 4294967168 }
0x15f1   :  { %1168 = vsyncpa [#allocation6], 1 }

</bundles_post_ra>
